<compile_context>
chip_gen: v6e
topology: v6e:2x2x1
jax: 0.10.0
libtpu: 0.0.40
codegen_flags: <defaults>
</compile_context>

<pallas_src>
import functools
import math

import jax
import jax.numpy as jnp
from jax.experimental import pallas as pl
from jax.experimental.pallas import tpu as pltpu


# -------------------------------------------------------------------- shared math helpers

def _gelu_tanh(x):
    # TODO(synk): HF 'gelu' is erf-exact; tanh-approx GELU used here (TPU EUP tanh), ~1e-3 divergence.
    c = 0.7978845608028654  # sqrt(2/pi)
    return 0.5 * x * (1.0 + jnp.tanh(c * (x + 0.044715 * x * x * x)))


def _layer_norm(x, g, b, eps):
    mu = jnp.mean(x, axis=-1, keepdims=True)
    var = jnp.mean(jnp.square(x - mu), axis=-1, keepdims=True)
    return (x - mu) * jax.lax.rsqrt(var + eps) * g + b


# -------------------------------------------------------------------- fused streaming kernel

def _adapter_model_kernel(
        # inputs (weights streamed per (adapter, layer) grid step)
        seq_ref, hid_ref,
        down_w_ref, down_b_ref, up_w_ref, up_b_ref,
        qkv_w_ref, qkv_b_ref, ao_w_ref, ao_b_ref,
        ln1_g_ref, ln1_b_ref, i_w_ref, i_b_ref,
        o_w_ref, o_b_ref, ln2_g_ref, ln2_b_ref,
        td_top_ref, td_bot_ref, td_b_ref,
        # output
        out_ref,
        # VMEM scratch carried across the (adapter, layer) "arbitrary" grid axes
        h_sc, ctx_sc, fus_sc, last_sc, *opt_scratch,
        # static configuration
        n_adapters, n_layers, num_heads, adapter_skip_layers,
        fusion_mode, a_rate, b_rate, eps, compute_dtype):
    i = pl.program_id(1)           # adapter index   ("arbitrary" axis)
    l = pl.program_id(2)           # BERT layer index ("arbitrary" axis)
    S, A = h_sc.shape
    hd = A // num_heads
    scale = 1.0 / math.sqrt(hd)
    cd = compute_dtype

    # ---------------- adapter entry: residual fusion + down-projection ----------------
    @pl.when(l == 0)
    def _adapter_entry():
        @pl.when(i == 0)
        def _reset():
            last_sc[...] = jnp.zeros_like(last_sc)
        # fusion_state = hidden_states[adapter_list[i]] + hidden_states_last
        fusion = hid_ref[0, 0].astype(jnp.float32) + last_sc[...]
        fus_sc[...] = fusion
        h_sc[...] = (jnp.dot(fusion.astype(cd), down_w_ref[0],
                             preferred_element_type=jnp.float32) + down_b_ref[0])

    # ---------------- one BertLayer (this step's weights are the only ones in VMEM) ----
    x = h_sc[...]                                                           # (S, A) f32
    # Fused QKV projection: one (A, 3A) matmul instead of three N=A matmuls.
    qkv = (jnp.dot(x.astype(cd), qkv_w_ref[0, 0],
                   preferred_element_type=jnp.float32) + qkv_b_ref[0, 0])   # (S, 3A) f32

    # Per-head scaled-dot-product attention.  Each head's context is written to a lane
    # slice of ctx_sc so the attention output projection is a single K=A matmul against
    # the unsplit (A, A) weight (instead of num_heads K=hd matmuls).
    for h in range(num_heads):
        q_h = qkv[:, 0 * A + h * hd:0 * A + (h + 1) * hd].astype(cd)
        k_h = qkv[:, 1 * A + h * hd:1 * A + (h + 1) * hd].astype(cd)
        v_h = qkv[:, 2 * A + h * hd:2 * A + (h + 1) * hd].astype(cd)
        s = jax.lax.dot_general(q_h, k_h, (((1,), (1,)), ((), ())),
                                preferred_element_type=jnp.float32) * scale
        # additive attention mask is identically zero (all-ones input mask) -> omitted
        s = s - jnp.max(s, axis=-1, keepdims=True)
        e = jnp.exp(s)
        p = e * pl.reciprocal(jnp.sum(e, axis=-1, keepdims=True), approx=True)
        ctx_sc[:, h * hd:(h + 1) * hd] = jnp.dot(p.astype(cd), v_h,
                                                 preferred_element_type=jnp.float32)

    attn = (jnp.dot(ctx_sc[...].astype(cd), ao_w_ref[0, 0],
                    preferred_element_type=jnp.float32) + ao_b_ref[0, 0])
    # BertSelfOutput: dense -> (dropout=id) -> LayerNorm(residual)      (residual fused)
    h1 = _layer_norm(attn + x, ln1_g_ref[0, 0], ln1_b_ref[0, 0], eps)
    # BertIntermediate (gelu) + BertOutput + LayerNorm(residual)        (residual fused)
    inter = _gelu_tanh(jnp.dot(h1.astype(cd), i_w_ref[0, 0],
                               preferred_element_type=jnp.float32) + i_b_ref[0, 0])
    out = (jnp.dot(inter.astype(cd), o_w_ref[0, 0],
                   preferred_element_type=jnp.float32) + o_b_ref[0, 0])
    h_sc[...] = _layer_norm(out + h1, ln2_g_ref[0, 0], ln2_b_ref[0, 0], eps)

    # ---------------- adapter exit: up-projection + residual (+ skip fusion) -----------
    @pl.when(l == n_layers - 1)
    def _adapter_exit():
        up = (jnp.dot(h_sc[...].astype(cd), up_w_ref[0],
                      preferred_element_type=jnp.float32) + up_b_ref[0])
        new_hidden = fus_sc[...] + up
        last_sc[...] = new_hidden

        if adapter_skip_layers >= 1:
            states_sc = opt_scratch[0]
            states_sc[i] = new_hidden
            count = i + 1
            @pl.when(count % adapter_skip_layers == 0)
            def _skip_fuse():
                # TODO(synk): mirrors the original adapter_hidden_states[count // skip]
                # indexing, which overruns the list for adapter_skip_layers == 1 (PyTorch
                # raises IndexError there); clamped here instead of reading OOB VMEM.
                idx = jnp.minimum(count // adapter_skip_layers, n_adapters - 1)
                last_sc[...] = new_hidden + states_sc[idx]

        # ------------- final fusion with sequence_output (last adapter only) -----------
        @pl.when(i == n_adapters - 1)
        def _final_fusion():
            seq = seq_ref[0].astype(jnp.float32)
            hl = last_sc[...]
            if fusion_mode == "add":
                task = a_rate * seq + b_rate * hl
            else:
                # 'concat'/'attention': task_dense(cat(a*seq, b*hidden)) computed as two
                # matmuls against the split weight -- no (S, 2H) concat is materialized.
                task = (jnp.dot((a_rate * seq).astype(cd), td_top_ref[...],
                                preferred_element_type=jnp.float32)
                        + jnp.dot((b_rate * hl).astype(cd), td_bot_ref[...],
                                  preferred_element_type=jnp.float32)
                        + td_b_ref[...])
            out_ref[0] = task.astype(out_ref.dtype)


# -------------------------------------------------------------------- wrapper

def adapter_model_forward(pretrained_model_outputs, params, *,
                          adapter_list, adapter_skip_layers, num_heads,
                          fusion_mode="add", a_rate=0.5, b_rate=0.5,
                          layer_norm_eps=1e-5, compute_dtype=jnp.bfloat16):
    """Mirror of AdapterModel.forward as a single weight-streaming pallas_call."""
    outputs = pretrained_model_outputs
    sequence_output = outputs[0]
    hidden_states = outputs[2]
    B, S, H = sequence_output.shape
    n_ad = len(adapter_list)
    n_layers = params["qkv_w"].shape[1]
    A = params["down_w"].shape[-1]
    I_ = params["i_w"].shape[-1]
    assert A % num_heads == 0
    cd = compute_dtype

    # Per-adapter selected pretrained hidden states, stacked for in-kernel indexing.
    sel_hidden = jnp.stack([hidden_states[adapter_list[i]] for i in range(n_ad)], axis=0)

    # Matmul weights cast to bf16 on the host (MXU-native, halves weight DMA + VMEM);
    # biases / LayerNorm params stay f32 (they add into f32 accumulations).
    inputs_and_specs = [
        # (array, block_shape, index_map)   -- blocks carve only the leading axes,
        # so trailing block dims always equal the full array dims ((8,128) rule ok).
        (sequence_output, (1, S, H),        lambda b, i, l: (b, 0, 0)),
        (sel_hidden,      (1, 1, S, H),     lambda b, i, l: (i, b, 0, 0)),
        (params["down_w"].astype(cd), (1, H, A),        lambda b, i, l: (i, 0, 0)),
        (params["down_b"],            (1, 1, A),        lambda b, i, l: (i, 0, 0)),
        (params["up_w"].astype(cd),   (1, A, H),        lambda b, i, l: (i, 0, 0)),
        (params["up_b"],              (1, 1, H),        lambda b, i, l: (i, 0, 0)),
        (params["qkv_w"].astype(cd),  (1, 1, A, 3 * A), lambda b, i, l: (i, l, 0, 0)),
        (params["qkv_b"],             (1, 1, 1, 3 * A), lambda b, i, l: (i, l, 0, 0)),
        (params["ao_w"].astype(cd),   (1, 1, A, A),     lambda b, i, l: (i, l, 0, 0)),
        (params["ao_b"],              (1, 1, 1, A),     lambda b, i, l: (i, l, 0, 0)),
        (params["ln1_g"],             (1, 1, 1, A),     lambda b, i, l: (i, l, 0, 0)),
        (params["ln1_b"],             (1, 1, 1, A),     lambda b, i, l: (i, l, 0, 0)),
        (params["i_w"].astype(cd),    (1, 1, A, I_),    lambda b, i, l: (i, l, 0, 0)),
        (params["i_b"],               (1, 1, 1, I_),    lambda b, i, l: (i, l, 0, 0)),
        (params["o_w"].astype(cd),    (1, 1, I_, A),    lambda b, i, l: (i, l, 0, 0)),
        (params["o_b"],               (1, 1, 1, A),     lambda b, i, l: (i, l, 0, 0)),
        (params["ln2_g"],             (1, 1, 1, A),     lambda b, i, l: (i, l, 0, 0)),
        (params["ln2_b"],             (1, 1, 1, A),     lambda b, i, l: (i, l, 0, 0)),
        (params["task_dense_w_top"].astype(cd), (H, H), lambda b, i, l: (0, 0)),
        (params["task_dense_w_bot"].astype(cd), (H, H), lambda b, i, l: (0, 0)),
        (params["task_dense_b"],                (1, H), lambda b, i, l: (0, 0)),
    ]
    arrays = [a for a, _, _ in inputs_and_specs]
    in_specs = [pl.BlockSpec(shape, idx) for _, shape, idx in inputs_and_specs]

    # VMEM scratch carried across the (adapter, layer) "arbitrary" axes.
    scratch_shapes = [
        pltpu.VMEM((S, A), jnp.float32),   # h   : activation through the BERT layers
        pltpu.VMEM((S, A), jnp.float32),   # ctx : assembled per-head attention contexts
        pltpu.VMEM((S, H), jnp.float32),   # fusion_state of the current adapter
        pltpu.VMEM((S, H), jnp.float32),   # hidden_states_last
    ]
    if adapter_skip_layers >= 1:
        scratch_shapes.append(pltpu.VMEM((n_ad, S, H), jnp.float32))  # adapter_hidden_states

    # Explicit VMEM budget: double-buffered per-step blocks + output + scratch + headroom,
    # capped at 48 MiB (under every generation's physical VMEM; v7x has 64 MiB per TC).
    def _blk_bytes(arr, shape):
        n = 1
        for d in shape:
            n *= d
        return n * jnp.dtype(arr.dtype).itemsize
    step_bytes = sum(_blk_bytes(a, s) for a, s, _ in inputs_and_specs)
    out_blk_bytes = S * H * jnp.dtype(sequence_output.dtype).itemsize
    scratch_bytes = (2 * S * A + 2 * S * H) * 4
    if adapter_skip_layers >= 1:
        scratch_bytes += n_ad * S * H * 4
    est = 2 * (step_bytes + out_blk_bytes) + scratch_bytes + (8 << 20)
    vmem_limit = int(min(max(est, 32 << 20), 48 << 20))

    kernel = functools.partial(
        _adapter_model_kernel,
        n_adapters=n_ad, n_layers=n_layers, num_heads=num_heads,
        adapter_skip_layers=adapter_skip_layers, fusion_mode=fusion_mode,
        a_rate=a_rate, b_rate=b_rate, eps=layer_norm_eps, compute_dtype=cd)

    task_features = pl.pallas_call(
        kernel,
        out_shape=jax.ShapeDtypeStruct((B, S, H), sequence_output.dtype),
        grid=(B, n_ad, n_layers),
        in_specs=in_specs,
        out_specs=pl.BlockSpec((1, S, H), lambda b, i, l: (b, 0, 0)),
        scratch_shapes=scratch_shapes,
        compiler_params=pltpu.CompilerParams(
            # batch shards across TensorCores; adapter/layer carry VMEM state so they
            # must stay sequential.
            dimension_semantics=("parallel", "arbitrary", "arbitrary"),
            vmem_limit_bytes=vmem_limit,
        ),
    )(*arrays)

    return (task_features,) + outputs[2:]


# -------------------------------------------------------------------- plain-jnp reference
# Same numeric recipe as the kernel (bf16 matmul operands, f32 accumulation,
# f32 LayerNorm/softmax/GELU) so the comparison tolerance can be tight.

def _reference_forward(pretrained_model_outputs, params, *,
                       adapter_list, adapter_skip_layers, num_heads,
                       fusion_mode="add", a_rate=0.5, b_rate=0.5,
                       layer_norm_eps=1e-5, compute_dtype=jnp.bfloat16):
    cd = compute_dtype

    def mm(x, w):
        return jnp.einsum("...ij,jk->...ik", x.astype(cd), w.astype(cd),
                          preferred_element_type=jnp.float32)

    outputs = pretrained_model_outputs
    seq = outputs[0].astype(jnp.float32)
    hidden_states = outputs[2]
    n_ad = len(adapter_list)
    L = params["qkv_w"].shape[1]
    A = params["down_w"].shape[-1]
    hd = A // num_heads
    scale = 1.0 / math.sqrt(hd)

    hidden_last = jnp.zeros_like(seq)
    states = []
    for i in range(n_ad):
        fusion = hidden_states[adapter_list[i]].astype(jnp.float32) + hidden_last
        h = mm(fusion, params["down_w"][i]) + params["down_b"][i]
        for l in range(L):
            qkv = mm(h, params["qkv_w"][i, l]) + params["qkv_b"][i, l]
            ctx_parts = []
            for hh in range(num_heads):
                q_h = qkv[..., 0 * A + hh * hd:0 * A + (hh + 1) * hd]
                k_h = qkv[..., 1 * A + hh * hd:1 * A + (hh + 1) * hd]
                v_h = qkv[..., 2 * A + hh * hd:2 * A + (hh + 1) * hd]
                s = jnp.einsum("bqd,bkd->bqk", q_h.astype(cd), k_h.astype(cd),
                               preferred_element_type=jnp.float32) * scale
                s = s - jnp.max(s, axis=-1, keepdims=True)
                e = jnp.exp(s)
                p = e / jnp.sum(e, axis=-1, keepdims=True)
                ctx_parts.append(jnp.einsum("bqk,bkd->bqd", p.astype(cd), v_h.astype(cd),
                                            preferred_element_type=jnp.float32))
            ctx = jnp.concatenate(ctx_parts, axis=-1)
            attn = mm(ctx, params["ao_w"][i, l]) + params["ao_b"][i, l]
            h1 = _layer_norm(attn + h, params["ln1_g"][i, l], params["ln1_b"][i, l],
                             layer_norm_eps)
            inter = _gelu_tanh(mm(h1, params["i_w"][i, l]) + params["i_b"][i, l])
            out = mm(inter, params["o_w"][i, l]) + params["o_b"][i, l]
            h = _layer_norm(out + h1, params["ln2_g"][i, l], params["ln2_b"][i, l],
                            layer_norm_eps)
        up = mm(h, params["up_w"][i]) + params["up_b"][i]
        hidden_last = fusion + up
        states.append(hidden_last)
        count = i + 1
        if adapter_skip_layers >= 1 and count % adapter_skip_layers == 0:
            idx = min(count // adapter_skip_layers, n_ad - 1)   # clamped, matches kernel
            hidden_last = hidden_last + states[idx]

    if fusion_mode == "add":
        task = a_rate * seq + b_rate * hidden_last
    else:
        task = (mm(a_rate * seq, params["task_dense_w_top"])
                + mm(b_rate * hidden_last, params["task_dense_w_bot"])
                + params["task_dense_b"])
    return (task,) + outputs[2:]


# -------------------------------------------------------------------- deterministic param init

def _uniform(key, shape, rng=0.02):
    return jax.random.uniform(key, shape, jnp.float32, -rng, rng)


def init_model_params(key, H, A, I_, L, n_adapters):
    k_ad, k_td = jax.random.split(key)

    def one_adapter(k):
        k_dw, k_db, k_uw, k_ub, k_layers = jax.random.split(k, 5)
        lw = {n: [] for n in ("qkv_w", "qkv_b", "ao_w", "ao_b", "ln1_g", "ln1_b",
                              "i_w", "i_b", "o_w", "o_b", "ln2_g", "ln2_b")}
        for lk in jax.random.split(k_layers, L):
            ks = jax.random.split(lk, 12)
            lw["qkv_w"].append(_uniform(ks[0], (A, 3 * A)))
            lw["qkv_b"].append(_uniform(ks[1], (1, 3 * A)))
            lw["ao_w"].append(_uniform(ks[2], (A, A)))
            lw["ao_b"].append(_uniform(ks[3], (1, A)))
            lw["ln1_g"].append(1.0 + _uniform(ks[4], (1, A), 0.1))
            lw["ln1_b"].append(_uniform(ks[5], (1, A), 0.1))
            lw["i_w"].append(_uniform(ks[6], (A, I_)))
            lw["i_b"].append(_uniform(ks[7], (1, I_)))
            lw["o_w"].append(_uniform(ks[8], (I_, A)))
            lw["o_b"].append(_uniform(ks[9], (1, A)))
            lw["ln2_g"].append(1.0 + _uniform(ks[10], (1, A), 0.1))
            lw["ln2_b"].append(_uniform(ks[11], (1, A), 0.1))
        p = {n: jnp.stack(v) for n, v in lw.items()}
        p["down_w"] = _uniform(k_dw, (H, A))
        p["down_b"] = _uniform(k_db, (1, A))
        p["up_w"] = _uniform(k_uw, (A, H))
        p["up_b"] = _uniform(k_ub, (1, H))
        return p

    per = [one_adapter(k) for k in jax.random.split(k_ad, n_adapters)]
    params = {name: jnp.stack([p[name] for p in per], axis=0) for name in per[0]}
    k1, k2, k3 = jax.random.split(k_td, 3)
    # task_dense weight stored pre-split (top rows act on sequence_output, bottom on hidden_last)
    params["task_dense_w_top"] = _uniform(k1, (H, H))
    params["task_dense_w_bot"] = _uniform(k2, (H, H))
    params["task_dense_b"] = _uniform(k3, (1, H))
    return params


# -------------------------------------------------------------------- main

if __name__ == "__main__":
    # Small synthetic config (mirrors AdapterConfig structure at reduced sizes).
    # NOTE: real K-Adapter dims (H=768/1024, A=768, I=3072, S=512) are multiples of
    # 128 and hence naturally lane-dense with this kernel structure.
    B, S = 2, 8                 # batch, sequence
    H = 32                      # project_hidden_size (pretrained model hidden size)
    A = 16                      # adapter_size == encoder hidden_size
    I_ = 64                     # intermediate_size
    NUM_HEADS = 4               # num_attention_heads
    L = 2                       # adapter_transformer_layers (num_hidden_layers)
    ADAPTER_LIST = [0, 2]       # args.adapter_list
    ADAPTER_SKIP_LAYERS = 0     # args.adapter_skip_layers
    N_PRETRAINED_HIDDEN = 4     # len(outputs[2]) from the frozen backbone

    key = jax.random.PRNGKey(0)
    k_params, k_seq, k_hid = jax.random.split(key, 3)

    params = init_model_params(k_params, H, A, I_, L, n_adapters=len(ADAPTER_LIST))

    sequence_output = jax.random.normal(k_seq, (B, S, H), jnp.float32)
    hidden_states = tuple(
        jax.random.normal(k, (B, S, H), jnp.float32)
        for k in jax.random.split(k_hid, N_PRETRAINED_HIDDEN)
    )
    pooled_output = jnp.zeros((B, H), jnp.float32)  # unused by forward, placeholder slot
    pretrained_model_outputs = (sequence_output, pooled_output, hidden_states)

    common = dict(adapter_list=ADAPTER_LIST, adapter_skip_layers=ADAPTER_SKIP_LAYERS,
                  num_heads=NUM_HEADS, a_rate=0.5, b_rate=0.5,
                  layer_norm_eps=1e-5, compute_dtype=jnp.bfloat16)

    for mode in ("add", "concat"):
        outputs = adapter_model_forward(pretrained_model_outputs, params,
                                        fusion_mode=mode, **common)
        ref_outputs = _reference_forward(pretrained_model_outputs, params,
                                         fusion_mode=mode, **common)
        task = jax.block_until_ready(outputs[0])
        task_ref = jax.block_until_ready(ref_outputs[0])
        assert task.shape == (B, S, H)
        assert bool(jnp.all(jnp.isfinite(task)))
        max_err = float(jnp.max(jnp.abs(task - task_ref)))
        assert max_err < 2e-3, f"fusion_mode={mode}: mismatch vs jnp reference: {max_err}"

    print("KERNEL_OK")
</pallas_src>

<mosaic_0001>
module attributes {stable_mosaic.version = 11 : i64} {
  func.func @_adapter_model_kernel(%arg0: i32, %arg1: i32, %arg2: i32, %arg3: memref<1x8x32xf32, #tpu.memory_space<vmem>>, %arg4: memref<1x1x8x32xf32, #tpu.memory_space<vmem>>, %arg5: memref<1x32x16xbf16, #tpu.memory_space<vmem>>, %arg6: memref<1x1x16xf32, #tpu.memory_space<vmem>>, %arg7: memref<1x16x32xbf16, #tpu.memory_space<vmem>>, %arg8: memref<1x1x32xf32, #tpu.memory_space<vmem>>, %arg9: memref<1x1x16x48xbf16, #tpu.memory_space<vmem>>, %arg10: memref<1x1x1x48xf32, #tpu.memory_space<vmem>>, %arg11: memref<1x1x16x16xbf16, #tpu.memory_space<vmem>>, %arg12: memref<1x1x1x16xf32, #tpu.memory_space<vmem>>, %arg13: memref<1x1x1x16xf32, #tpu.memory_space<vmem>>, %arg14: memref<1x1x1x16xf32, #tpu.memory_space<vmem>>, %arg15: memref<1x1x16x64xbf16, #tpu.memory_space<vmem>>, %arg16: memref<1x1x1x64xf32, #tpu.memory_space<vmem>>, %arg17: memref<1x1x64x16xbf16, #tpu.memory_space<vmem>>, %arg18: memref<1x1x1x16xf32, #tpu.memory_space<vmem>>, %arg19: memref<1x1x1x16xf32, #tpu.memory_space<vmem>>, %arg20: memref<1x1x1x16xf32, #tpu.memory_space<vmem>>, %arg21: memref<32x32xbf16, #tpu.memory_space<vmem>>, %arg22: memref<32x32xbf16, #tpu.memory_space<vmem>>, %arg23: memref<1x32xf32, #tpu.memory_space<vmem>>, %arg24: memref<1x8x32xf32, #tpu.memory_space<vmem>>, %arg25: memref<8x16xf32, #tpu.memory_space<vmem>>, %arg26: memref<8x16xf32, #tpu.memory_space<vmem>>, %arg27: memref<8x32xf32, #tpu.memory_space<vmem>>, %arg28: memref<8x32xf32, #tpu.memory_space<vmem>>) attributes {dimension_semantics = [#tpu.dimension_semantics<parallel>, #tpu.dimension_semantics<arbitrary>, #tpu.dimension_semantics<arbitrary>], iteration_bounds = array<i64: 2, 2, 2>, scalar_prefetch = 0 : i64, scratch_operands = 4 : i64, tpu.core_type = #tpu.core_type<tc>, window_params = [{transform_indices = @transform_0, window_bounds = array<i64: 1, 8, 32>}, {transform_indices = @transform_1, window_bounds = array<i64: 1, 1, 8, 32>}, {transform_indices = @transform_2, window_bounds = array<i64: 1, 32, 16>}, {transform_indices = @transform_3, window_bounds = array<i64: 1, 1, 16>}, {transform_indices = @transform_4, window_bounds = array<i64: 1, 16, 32>}, {transform_indices = @transform_5, window_bounds = array<i64: 1, 1, 32>}, {transform_indices = @transform_6, window_bounds = array<i64: 1, 1, 16, 48>}, {transform_indices = @transform_7, window_bounds = array<i64: 1, 1, 1, 48>}, {transform_indices = @transform_8, window_bounds = array<i64: 1, 1, 16, 16>}, {transform_indices = @transform_9, window_bounds = array<i64: 1, 1, 1, 16>}, {transform_indices = @transform_10, window_bounds = array<i64: 1, 1, 1, 16>}, {transform_indices = @transform_11, window_bounds = array<i64: 1, 1, 1, 16>}, {transform_indices = @transform_12, window_bounds = array<i64: 1, 1, 16, 64>}, {transform_indices = @transform_13, window_bounds = array<i64: 1, 1, 1, 64>}, {transform_indices = @transform_14, window_bounds = array<i64: 1, 1, 64, 16>}, {transform_indices = @transform_15, window_bounds = array<i64: 1, 1, 1, 16>}, {transform_indices = @transform_16, window_bounds = array<i64: 1, 1, 1, 16>}, {transform_indices = @transform_17, window_bounds = array<i64: 1, 1, 1, 16>}, {pipeline_mode = #tpu.pipeline_mode<synchronous>, transform_indices = @transform_18, window_bounds = array<i64: 32, 32>}, {pipeline_mode = #tpu.pipeline_mode<synchronous>, transform_indices = @transform_19, window_bounds = array<i64: 32, 32>}, {pipeline_mode = #tpu.pipeline_mode<synchronous>, transform_indices = @transform_20, window_bounds = array<i64: 1, 32>}, {transform_indices = @transform_21, window_bounds = array<i64: 1, 8, 32>}]} {
    %c0_i32 = arith.constant 0 : i32
    %0 = arith.cmpi eq, %arg2, %c0_i32 : i32
    %1 = arith.extui %0 : i1 to i32
    %c0_i32_0 = arith.constant 0 : i32
    %2 = arith.cmpi ne, %1, %c0_i32_0 : i32
    scf.if %2 {
      %c0_i32_97 = arith.constant 0 : i32
      %196 = arith.cmpi eq, %arg1, %c0_i32_97 : i32
      %197 = arith.extui %196 : i1 to i32
      %c0_i32_98 = arith.constant 0 : i32
      %198 = arith.cmpi ne, %197, %c0_i32_98 : i32
      scf.if %198 {
        %cst_116 = arith.constant 0.000000e+00 : f32
        %213 = vector.broadcast %cst_116 : f32 to vector<8x32xf32>
        %c0_117 = arith.constant 0 : index
        %c0_118 = arith.constant 0 : index
        %214 = vector.load %arg28[%c0_117, %c0_118] : memref<8x32xf32, #tpu.memory_space<vmem>>, vector<8x32xf32>
        tpu.vector_store %arg28[%c0_117, %c0_118], %213 {strides = array<i32>} : memref<8x32xf32, #tpu.memory_space<vmem>>, vector<8x32xf32>,
      } else {
      }
      %c0_99 = arith.constant 0 : index
      %c0_100 = arith.constant 0 : index
      %c0_101 = arith.constant 0 : index
      %c0_102 = arith.constant 0 : index
      %199 = vector.load %arg4[%c0_99, %c0_100, %c0_101, %c0_102] : memref<1x1x8x32xf32, #tpu.memory_space<vmem>>, vector<1x1x8x32xf32>
      %200 = vector.shape_cast %199 : vector<1x1x8x32xf32> to vector<8x32xf32>
      %c0_103 = arith.constant 0 : index
      %c0_104 = arith.constant 0 : index
      %201 = vector.load %arg28[%c0_103, %c0_104] : memref<8x32xf32, #tpu.memory_space<vmem>>, vector<8x32xf32>
      %202 = arith.addf %200, %201 : vector<8x32xf32>
      %c0_105 = arith.constant 0 : index
      %c0_106 = arith.constant 0 : index
      %203 = vector.load %arg27[%c0_105, %c0_106] : memref<8x32xf32, #tpu.memory_space<vmem>>, vector<8x32xf32>
      tpu.vector_store %arg27[%c0_105, %c0_106], %202 {strides = array<i32>} : memref<8x32xf32, #tpu.memory_space<vmem>>, vector<8x32xf32>,
      %204 = arith.truncf %202 : vector<8x32xf32> to vector<8x32xbf16>
      %c0_107 = arith.constant 0 : index
      %c0_108 = arith.constant 0 : index
      %c0_109 = arith.constant 0 : index
      %205 = vector.load %arg5[%c0_107, %c0_108, %c0_109] : memref<1x32x16xbf16, #tpu.memory_space<vmem>>, vector<1x32x16xbf16>
      %206 = vector.shape_cast %205 : vector<1x32x16xbf16> to vector<32x16xbf16>
      %cst_110 = arith.constant dense<0.000000e+00> : vector<8x16xf32>
      %207 = tpu.matmul %204, %206, %cst_110 {dimension_numbers = #tpu.dot_dimension_numbers<[1], [0], [0], [1], [0, 0, 1, 1], [], []>} : vector<8x32xbf16>, vector<32x16xbf16>, vector<8x16xf32> -> vector<8x16xf32>
      %c0_111 = arith.constant 0 : index
      %c0_112 = arith.constant 0 : index
      %c0_113 = arith.constant 0 : index
      %208 = vector.load %arg6[%c0_111, %c0_112, %c0_113] : memref<1x1x16xf32, #tpu.memory_space<vmem>>, vector<1x1x16xf32>
      %209 = vector.shape_cast %208 : vector<1x1x16xf32> to vector<1x16xf32>
      %210 = vector.broadcast %209 : vector<1x16xf32> to vector<8x16xf32>
      %211 = arith.addf %207, %210 : vector<8x16xf32>
      %c0_114 = arith.constant 0 : index
      %c0_115 = arith.constant 0 : index
      %212 = vector.load %arg25[%c0_114, %c0_115] : memref<8x16xf32, #tpu.memory_space<vmem>>, vector<8x16xf32>
      tpu.vector_store %arg25[%c0_114, %c0_115], %211 {strides = array<i32>} : memref<8x16xf32, #tpu.memory_space<vmem>>, vector<8x16xf32>,
    } else {
    }
    %c0 = arith.constant 0 : index
    %c0_1 = arith.constant 0 : index
    %3 = vector.load %arg25[%c0, %c0_1] : memref<8x16xf32, #tpu.memory_space<vmem>>, vector<8x16xf32>
    %4 = arith.truncf %3 : vector<8x16xf32> to vector<8x16xbf16>
    %c0_2 = arith.constant 0 : index
    %c0_3 = arith.constant 0 : index
    %c0_4 = arith.constant 0 : index
    %c0_5 = arith.constant 0 : index
    %5 = vector.load %arg9[%c0_2, %c0_3, %c0_4, %c0_5] : memref<1x1x16x48xbf16, #tpu.memory_space<vmem>>, vector<1x1x16x48xbf16>
    %6 = vector.shape_cast %5 : vector<1x1x16x48xbf16> to vector<16x48xbf16>
    %cst = arith.constant dense<0.000000e+00> : vector<8x48xf32>
    %7 = tpu.matmul %4, %6, %cst {dimension_numbers = #tpu.dot_dimension_numbers<[1], [0], [0], [1], [0, 0, 1, 1], [], []>} : vector<8x16xbf16>, vector<16x48xbf16>, vector<8x48xf32> -> vector<8x48xf32>
    %c0_6 = arith.constant 0 : index
    %c0_7 = arith.constant 0 : index
    %c0_8 = arith.constant 0 : index
    %c0_9 = arith.constant 0 : index
    %8 = vector.load %arg10[%c0_6, %c0_7, %c0_8, %c0_9] : memref<1x1x1x48xf32, #tpu.memory_space<vmem>>, vector<1x1x1x48xf32>
    %9 = vector.shape_cast %8 : vector<1x1x1x48xf32> to vector<1x48xf32>
    %10 = vector.broadcast %9 : vector<1x48xf32> to vector<8x48xf32>
    %11 = arith.addf %7, %10 : vector<8x48xf32>
    %12 = vector.extract_strided_slice %11 {offsets = [0, 0], sizes = [8, 4], strides = [1, 1]} : vector<8x48xf32> to vector<8x4xf32>
    %13 = arith.truncf %12 : vector<8x4xf32> to vector<8x4xbf16>
    %14 = vector.extract_strided_slice %11 {offsets = [0, 16], sizes = [8, 4], strides = [1, 1]} : vector<8x48xf32> to vector<8x4xf32>
    %15 = arith.truncf %14 : vector<8x4xf32> to vector<8x4xbf16>
    %16 = vector.extract_strided_slice %11 {offsets = [0, 32], sizes = [8, 4], strides = [1, 1]} : vector<8x48xf32> to vector<8x4xf32>
    %17 = arith.truncf %16 : vector<8x4xf32> to vector<8x4xbf16>
    %cst_10 = arith.constant dense<0.000000e+00> : vector<8x8xf32>
    %18 = tpu.matmul %13, %15, %cst_10 {dimension_numbers = #tpu.dot_dimension_numbers<[1], [1], [0], [0], [0, 0, 1, 0], [], []>} : vector<8x4xbf16>, vector<8x4xbf16>, vector<8x8xf32> -> vector<8x8xf32>
    %cst_11 = arith.constant 5.000000e-01 : f32
    %19 = vector.broadcast %cst_11 : f32 to vector<8x8xf32>
    %20 = arith.mulf %18, %19 : vector<8x8xf32>
    %cst_12 = arith.constant dense<0xFF800000> : vector<8xf32>
    %21 = vector.multi_reduction <maximumf>, %20, %cst_12 [1] : vector<8x8xf32> to vector<8xf32>
    %22 = vector.shape_cast %21 : vector<8xf32> to vector<8x1xf32>
    %23 = vector.broadcast %22 : vector<8x1xf32> to vector<8x8xf32>
    %24 = arith.subf %20, %23 : vector<8x8xf32>
    %25 = math.exp %24 : vector<8x8xf32>
    %cst_13 = arith.constant dense<0.000000e+00> : vector<8xf32>
    %26 = vector.multi_reduction <add>, %25, %cst_13 [1] : vector<8x8xf32> to vector<8xf32>
    %27 = vector.shape_cast %26 : vector<8xf32> to vector<8x1xf32>
    %28 = tpu.reciprocal %27 {approx = true} : vector<8x1xf32> -> vector<8x1xf32>
    %29 = vector.broadcast %28 : vector<8x1xf32> to vector<8x8xf32>
    %30 = arith.mulf %25, %29 : vector<8x8xf32>
    %31 = arith.truncf %30 : vector<8x8xf32> to vector<8x8xbf16>
    %cst_14 = arith.constant dense<0.000000e+00> : vector<8x4xf32>
    %32 = tpu.matmul %31, %17, %cst_14 {dimension_numbers = #tpu.dot_dimension_numbers<[1], [0], [0], [1], [0, 0, 1, 1], [], []>} : vector<8x8xbf16>, vector<8x4xbf16>, vector<8x4xf32> -> vector<8x4xf32>
    %c0_15 = arith.constant 0 : index
    %c0_16 = arith.constant 0 : index
    %33 = vector.load %arg26[%c0_15, %c0_16] : memref<8x16xf32, #tpu.memory_space<vmem>>, vector<8x4xf32>
    tpu.vector_store %arg26[%c0_15, %c0_16], %32 {strides = array<i32>} : memref<8x16xf32, #tpu.memory_space<vmem>>, vector<8x4xf32>,
    %34 = vector.extract_strided_slice %11 {offsets = [0, 4], sizes = [8, 4], strides = [1, 1]} : vector<8x48xf32> to vector<8x4xf32>
    %35 = arith.truncf %34 : vector<8x4xf32> to vector<8x4xbf16>
    %36 = vector.extract_strided_slice %11 {offsets = [0, 20], sizes = [8, 4], strides = [1, 1]} : vector<8x48xf32> to vector<8x4xf32>
    %37 = arith.truncf %36 : vector<8x4xf32> to vector<8x4xbf16>
    %38 = vector.extract_strided_slice %11 {offsets = [0, 36], sizes = [8, 4], strides = [1, 1]} : vector<8x48xf32> to vector<8x4xf32>
    %39 = arith.truncf %38 : vector<8x4xf32> to vector<8x4xbf16>
    %cst_17 = arith.constant dense<0.000000e+00> : vector<8x8xf32>
    %40 = tpu.matmul %35, %37, %cst_17 {dimension_numbers = #tpu.dot_dimension_numbers<[1], [1], [0], [0], [0, 0, 1, 0], [], []>} : vector<8x4xbf16>, vector<8x4xbf16>, vector<8x8xf32> -> vector<8x8xf32>
    %cst_18 = arith.constant 5.000000e-01 : f32
    %41 = vector.broadcast %cst_18 : f32 to vector<8x8xf32>
    %42 = arith.mulf %40, %41 : vector<8x8xf32>
    %cst_19 = arith.constant dense<0xFF800000> : vector<8xf32>
    %43 = vector.multi_reduction <maximumf>, %42, %cst_19 [1] : vector<8x8xf32> to vector<8xf32>
    %44 = vector.shape_cast %43 : vector<8xf32> to vector<8x1xf32>
    %45 = vector.broadcast %44 : vector<8x1xf32> to vector<8x8xf32>
    %46 = arith.subf %42, %45 : vector<8x8xf32>
    %47 = math.exp %46 : vector<8x8xf32>
    %cst_20 = arith.constant dense<0.000000e+00> : vector<8xf32>
    %48 = vector.multi_reduction <add>, %47, %cst_20 [1] : vector<8x8xf32> to vector<8xf32>
    %49 = vector.shape_cast %48 : vector<8xf32> to vector<8x1xf32>
    %50 = tpu.reciprocal %49 {approx = true} : vector<8x1xf32> -> vector<8x1xf32>
    %51 = vector.broadcast %50 : vector<8x1xf32> to vector<8x8xf32>
    %52 = arith.mulf %47, %51 : vector<8x8xf32>
    %53 = arith.truncf %52 : vector<8x8xf32> to vector<8x8xbf16>
    %cst_21 = arith.constant dense<0.000000e+00> : vector<8x4xf32>
    %54 = tpu.matmul %53, %39, %cst_21 {dimension_numbers = #tpu.dot_dimension_numbers<[1], [0], [0], [1], [0, 0, 1, 1], [], []>} : vector<8x8xbf16>, vector<8x4xbf16>, vector<8x4xf32> -> vector<8x4xf32>
    %c0_22 = arith.constant 0 : index
    %c4 = arith.constant 4 : index
    %55 = vector.load %arg26[%c0_22, %c4] : memref<8x16xf32, #tpu.memory_space<vmem>>, vector<8x4xf32>
    tpu.vector_store %arg26[%c0_22, %c4], %54 {strides = array<i32>} : memref<8x16xf32, #tpu.memory_space<vmem>>, vector<8x4xf32>,
    %56 = vector.extract_strided_slice %11 {offsets = [0, 8], sizes = [8, 4], strides = [1, 1]} : vector<8x48xf32> to vector<8x4xf32>
    %57 = arith.truncf %56 : vector<8x4xf32> to vector<8x4xbf16>
    %58 = vector.extract_strided_slice %11 {offsets = [0, 24], sizes = [8, 4], strides = [1, 1]} : vector<8x48xf32> to vector<8x4xf32>
    %59 = arith.truncf %58 : vector<8x4xf32> to vector<8x4xbf16>
    %60 = vector.extract_strided_slice %11 {offsets = [0, 40], sizes = [8, 4], strides = [1, 1]} : vector<8x48xf32> to vector<8x4xf32>
    %61 = arith.truncf %60 : vector<8x4xf32> to vector<8x4xbf16>
    %cst_23 = arith.constant dense<0.000000e+00> : vector<8x8xf32>
    %62 = tpu.matmul %57, %59, %cst_23 {dimension_numbers = #tpu.dot_dimension_numbers<[1], [1], [0], [0], [0, 0, 1, 0], [], []>} : vector<8x4xbf16>, vector<8x4xbf16>, vector<8x8xf32> -> vector<8x8xf32>
    %cst_24 = arith.constant 5.000000e-01 : f32
    %63 = vector.broadcast %cst_24 : f32 to vector<8x8xf32>
    %64 = arith.mulf %62, %63 : vector<8x8xf32>
    %cst_25 = arith.constant dense<0xFF800000> : vector<8xf32>
    %65 = vector.multi_reduction <maximumf>, %64, %cst_25 [1] : vector<8x8xf32> to vector<8xf32>
    %66 = vector.shape_cast %65 : vector<8xf32> to vector<8x1xf32>
    %67 = vector.broadcast %66 : vector<8x1xf32> to vector<8x8xf32>
    %68 = arith.subf %64, %67 : vector<8x8xf32>
    %69 = math.exp %68 : vector<8x8xf32>
    %cst_26 = arith.constant dense<0.000000e+00> : vector<8xf32>
    %70 = vector.multi_reduction <add>, %69, %cst_26 [1] : vector<8x8xf32> to vector<8xf32>
    %71 = vector.shape_cast %70 : vector<8xf32> to vector<8x1xf32>
    %72 = tpu.reciprocal %71 {approx = true} : vector<8x1xf32> -> vector<8x1xf32>
    %73 = vector.broadcast %72 : vector<8x1xf32> to vector<8x8xf32>
    %74 = arith.mulf %69, %73 : vector<8x8xf32>
    %75 = arith.truncf %74 : vector<8x8xf32> to vector<8x8xbf16>
    %cst_27 = arith.constant dense<0.000000e+00> : vector<8x4xf32>
    %76 = tpu.matmul %75, %61, %cst_27 {dimension_numbers = #tpu.dot_dimension_numbers<[1], [0], [0], [1], [0, 0, 1, 1], [], []>} : vector<8x8xbf16>, vector<8x4xbf16>, vector<8x4xf32> -> vector<8x4xf32>
    %c0_28 = arith.constant 0 : index
    %c8 = arith.constant 8 : index
    %77 = vector.load %arg26[%c0_28, %c8] : memref<8x16xf32, #tpu.memory_space<vmem>>, vector<8x4xf32>
    tpu.vector_store %arg26[%c0_28, %c8], %76 {strides = array<i32>} : memref<8x16xf32, #tpu.memory_space<vmem>>, vector<8x4xf32>,
    %78 = vector.extract_strided_slice %11 {offsets = [0, 12], sizes = [8, 4], strides = [1, 1]} : vector<8x48xf32> to vector<8x4xf32>
    %79 = arith.truncf %78 : vector<8x4xf32> to vector<8x4xbf16>
    %80 = vector.extract_strided_slice %11 {offsets = [0, 28], sizes = [8, 4], strides = [1, 1]} : vector<8x48xf32> to vector<8x4xf32>
    %81 = arith.truncf %80 : vector<8x4xf32> to vector<8x4xbf16>
    %82 = vector.extract_strided_slice %11 {offsets = [0, 44], sizes = [8, 4], strides = [1, 1]} : vector<8x48xf32> to vector<8x4xf32>
    %83 = arith.truncf %82 : vector<8x4xf32> to vector<8x4xbf16>
    %cst_29 = arith.constant dense<0.000000e+00> : vector<8x8xf32>
    %84 = tpu.matmul %79, %81, %cst_29 {dimension_numbers = #tpu.dot_dimension_numbers<[1], [1], [0], [0], [0, 0, 1, 0], [], []>} : vector<8x4xbf16>, vector<8x4xbf16>, vector<8x8xf32> -> vector<8x8xf32>
    %cst_30 = arith.constant 5.000000e-01 : f32
    %85 = vector.broadcast %cst_30 : f32 to vector<8x8xf32>
    %86 = arith.mulf %84, %85 : vector<8x8xf32>
    %cst_31 = arith.constant dense<0xFF800000> : vector<8xf32>
    %87 = vector.multi_reduction <maximumf>, %86, %cst_31 [1] : vector<8x8xf32> to vector<8xf32>
    %88 = vector.shape_cast %87 : vector<8xf32> to vector<8x1xf32>
    %89 = vector.broadcast %88 : vector<8x1xf32> to vector<8x8xf32>
    %90 = arith.subf %86, %89 : vector<8x8xf32>
    %91 = math.exp %90 : vector<8x8xf32>
    %cst_32 = arith.constant dense<0.000000e+00> : vector<8xf32>
    %92 = vector.multi_reduction <add>, %91, %cst_32 [1] : vector<8x8xf32> to vector<8xf32>
    %93 = vector.shape_cast %92 : vector<8xf32> to vector<8x1xf32>
    %94 = tpu.reciprocal %93 {approx = true} : vector<8x1xf32> -> vector<8x1xf32>
    %95 = vector.broadcast %94 : vector<8x1xf32> to vector<8x8xf32>
    %96 = arith.mulf %91, %95 : vector<8x8xf32>
    %97 = arith.truncf %96 : vector<8x8xf32> to vector<8x8xbf16>
    %cst_33 = arith.constant dense<0.000000e+00> : vector<8x4xf32>
    %98 = tpu.matmul %97, %83, %cst_33 {dimension_numbers = #tpu.dot_dimension_numbers<[1], [0], [0], [1], [0, 0, 1, 1], [], []>} : vector<8x8xbf16>, vector<8x4xbf16>, vector<8x4xf32> -> vector<8x4xf32>
    %c0_34 = arith.constant 0 : index
    %c12 = arith.constant 12 : index
    %99 = vector.load %arg26[%c0_34, %c12] : memref<8x16xf32, #tpu.memory_space<vmem>>, vector<8x4xf32>
    tpu.vector_store %arg26[%c0_34, %c12], %98 {strides = array<i32>} : memref<8x16xf32, #tpu.memory_space<vmem>>, vector<8x4xf32>,
    %c0_35 = arith.constant 0 : index
    %c0_36 = arith.constant 0 : index
    %100 = vector.load %arg26[%c0_35, %c0_36] : memref<8x16xf32, #tpu.memory_space<vmem>>, vector<8x16xf32>
    %101 = arith.truncf %100 : vector<8x16xf32> to vector<8x16xbf16>
    %c0_37 = arith.constant 0 : index
    %c0_38 = arith.constant 0 : index
    %c0_39 = arith.constant 0 : index
    %c0_40 = arith.constant 0 : index
    %102 = vector.load %arg11[%c0_37, %c0_38, %c0_39, %c0_40] : memref<1x1x16x16xbf16, #tpu.memory_space<vmem>>, vector<1x1x16x16xbf16>
    %103 = vector.shape_cast %102 : vector<1x1x16x16xbf16> to vector<16x16xbf16>
    %cst_41 = arith.constant dense<0.000000e+00> : vector<8x16xf32>
    %104 = tpu.matmul %101, %103, %cst_41 {dimension_numbers = #tpu.dot_dimension_numbers<[1], [0], [0], [1], [0, 0, 1, 1], [], []>} : vector<8x16xbf16>, vector<16x16xbf16>, vector<8x16xf32> -> vector<8x16xf32>
    %c0_42 = arith.constant 0 : index
    %c0_43 = arith.constant 0 : index
    %c0_44 = arith.constant 0 : index
    %c0_45 = arith.constant 0 : index
    %105 = vector.load %arg12[%c0_42, %c0_43, %c0_44, %c0_45] : memref<1x1x1x16xf32, #tpu.memory_space<vmem>>, vector<1x1x1x16xf32>
    %106 = vector.shape_cast %105 : vector<1x1x1x16xf32> to vector<1x16xf32>
    %107 = vector.broadcast %106 : vector<1x16xf32> to vector<8x16xf32>
    %108 = arith.addf %104, %107 : vector<8x16xf32>
    %109 = arith.addf %108, %3 : vector<8x16xf32>
    %c0_46 = arith.constant 0 : index
    %c0_47 = arith.constant 0 : index
    %c0_48 = arith.constant 0 : index
    %c0_49 = arith.constant 0 : index
    %110 = vector.load %arg13[%c0_46, %c0_47, %c0_48, %c0_49] : memref<1x1x1x16xf32, #tpu.memory_space<vmem>>, vector<1x1x1x16xf32>
    %111 = vector.shape_cast %110 : vector<1x1x1x16xf32> to vector<1x16xf32>
    %c0_50 = arith.constant 0 : index
    %c0_51 = arith.constant 0 : index
    %c0_52 = arith.constant 0 : index
    %c0_53 = arith.constant 0 : index
    %112 = vector.load %arg14[%c0_50, %c0_51, %c0_52, %c0_53] : memref<1x1x1x16xf32, #tpu.memory_space<vmem>>, vector<1x1x1x16xf32>
    %113 = vector.shape_cast %112 : vector<1x1x1x16xf32> to vector<1x16xf32>
    %cst_54 = arith.constant dense<0.000000e+00> : vector<8xf32>
    %114 = vector.multi_reduction <add>, %109, %cst_54 [1] : vector<8x16xf32> to vector<8xf32>
    %115 = vector.shape_cast %114 : vector<8xf32> to vector<8x1xf32>
    %cst_55 = arith.constant 1.600000e+01 : f32
    %116 = vector.broadcast %cst_55 : f32 to vector<8x1xf32>
    %117 = arith.divf %115, %116 : vector<8x1xf32>
    %118 = vector.broadcast %117 : vector<8x1xf32> to vector<8x16xf32>
    %119 = arith.subf %109, %118 : vector<8x16xf32>
    %120 = arith.mulf %119, %119 : vector<8x16xf32>
    %cst_56 = arith.constant dense<0.000000e+00> : vector<8xf32>
    %121 = vector.multi_reduction <add>, %120, %cst_56 [1] : vector<8x16xf32> to vector<8xf32>
    %122 = vector.shape_cast %121 : vector<8xf32> to vector<8x1xf32>
    %cst_57 = arith.constant 1.600000e+01 : f32
    %123 = vector.broadcast %cst_57 : f32 to vector<8x1xf32>
    %124 = arith.divf %122, %123 : vector<8x1xf32>
    %125 = vector.broadcast %117 : vector<8x1xf32> to vector<8x16xf32>
    %126 = arith.subf %109, %125 : vector<8x16xf32>
    %cst_58 = arith.constant 9.99999974E-6 : f32
    %127 = vector.broadcast %cst_58 : f32 to vector<8x1xf32>
    %128 = arith.addf %124, %127 : vector<8x1xf32>
    %129 = math.rsqrt %128 : vector<8x1xf32>
    %130 = vector.broadcast %129 : vector<8x1xf32> to vector<8x16xf32>
    %131 = arith.mulf %126, %130 : vector<8x16xf32>
    %132 = vector.broadcast %111 : vector<1x16xf32> to vector<8x16xf32>
    %133 = arith.mulf %131, %132 : vector<8x16xf32>
    %134 = vector.broadcast %113 : vector<1x16xf32> to vector<8x16xf32>
    %135 = arith.addf %133, %134 : vector<8x16xf32>
    %136 = arith.truncf %135 : vector<8x16xf32> to vector<8x16xbf16>
    %c0_59 = arith.constant 0 : index
    %c0_60 = arith.constant 0 : index
    %c0_61 = arith.constant 0 : index
    %c0_62 = arith.constant 0 : index
    %137 = vector.load %arg15[%c0_59, %c0_60, %c0_61, %c0_62] : memref<1x1x16x64xbf16, #tpu.memory_space<vmem>>, vector<1x1x16x64xbf16>
    %138 = vector.shape_cast %137 : vector<1x1x16x64xbf16> to vector<16x64xbf16>
    %cst_63 = arith.constant dense<0.000000e+00> : vector<8x64xf32>
    %139 = tpu.matmul %136, %138, %cst_63 {dimension_numbers = #tpu.dot_dimension_numbers<[1], [0], [0], [1], [0, 0, 1, 1], [], []>} : vector<8x16xbf16>, vector<16x64xbf16>, vector<8x64xf32> -> vector<8x64xf32>
    %c0_64 = arith.constant 0 : index
    %c0_65 = arith.constant 0 : index
    %c0_66 = arith.constant 0 : index
    %c0_67 = arith.constant 0 : index
    %140 = vector.load %arg16[%c0_64, %c0_65, %c0_66, %c0_67] : memref<1x1x1x64xf32, #tpu.memory_space<vmem>>, vector<1x1x1x64xf32>
    %141 = vector.shape_cast %140 : vector<1x1x1x64xf32> to vector<1x64xf32>
    %142 = vector.broadcast %141 : vector<1x64xf32> to vector<8x64xf32>
    %143 = arith.addf %139, %142 : vector<8x64xf32>
    %cst_68 = arith.constant 5.000000e-01 : f32
    %144 = vector.broadcast %cst_68 : f32 to vector<8x64xf32>
    %145 = arith.mulf %144, %143 : vector<8x64xf32>
    %cst_69 = arith.constant 4.471500e-02 : f32
    %146 = vector.broadcast %cst_69 : f32 to vector<8x64xf32>
    %147 = arith.mulf %146, %143 : vector<8x64xf32>
    %148 = arith.mulf %147, %143 : vector<8x64xf32>
    %149 = arith.mulf %148, %143 : vector<8x64xf32>
    %150 = arith.addf %143, %149 : vector<8x64xf32>
    %cst_70 = arith.constant 0.797884583 : f32
    %151 = vector.broadcast %cst_70 : f32 to vector<8x64xf32>
    %152 = arith.mulf %151, %150 : vector<8x64xf32>
    %153 = math.tanh %152 : vector<8x64xf32>
    %cst_71 = arith.constant 1.000000e+00 : f32
    %154 = vector.broadcast %cst_71 : f32 to vector<8x64xf32>
    %155 = arith.addf %154, %153 : vector<8x64xf32>
    %156 = arith.mulf %145, %155 : vector<8x64xf32>
    %157 = arith.truncf %156 : vector<8x64xf32> to vector<8x64xbf16>
    %c0_72 = arith.constant 0 : index
    %c0_73 = arith.constant 0 : index
    %c0_74 = arith.constant 0 : index
    %c0_75 = arith.constant 0 : index
    %158 = vector.load %arg17[%c0_72, %c0_73, %c0_74, %c0_75] : memref<1x1x64x16xbf16, #tpu.memory_space<vmem>>, vector<1x1x64x16xbf16>
    %159 = vector.shape_cast %158 : vector<1x1x64x16xbf16> to vector<64x16xbf16>
    %cst_76 = arith.constant dense<0.000000e+00> : vector<8x16xf32>
    %160 = tpu.matmul %157, %159, %cst_76 {dimension_numbers = #tpu.dot_dimension_numbers<[1], [0], [0], [1], [0, 0, 1, 1], [], []>} : vector<8x64xbf16>, vector<64x16xbf16>, vector<8x16xf32> -> vector<8x16xf32>
    %c0_77 = arith.constant 0 : index
    %c0_78 = arith.constant 0 : index
    %c0_79 = arith.constant 0 : index
    %c0_80 = arith.constant 0 : index
    %161 = vector.load %arg18[%c0_77, %c0_78, %c0_79, %c0_80] : memref<1x1x1x16xf32, #tpu.memory_space<vmem>>, vector<1x1x1x16xf32>
    %162 = vector.shape_cast %161 : vector<1x1x1x16xf32> to vector<1x16xf32>
    %163 = vector.broadcast %162 : vector<1x16xf32> to vector<8x16xf32>
    %164 = arith.addf %160, %163 : vector<8x16xf32>
    %165 = arith.addf %164, %135 : vector<8x16xf32>
    %c0_81 = arith.constant 0 : index
    %c0_82 = arith.constant 0 : index
    %c0_83 = arith.constant 0 : index
    %c0_84 = arith.constant 0 : index
    %166 = vector.load %arg19[%c0_81, %c0_82, %c0_83, %c0_84] : memref<1x1x1x16xf32, #tpu.memory_space<vmem>>, vector<1x1x1x16xf32>
    %167 = vector.shape_cast %166 : vector<1x1x1x16xf32> to vector<1x16xf32>
    %c0_85 = arith.constant 0 : index
    %c0_86 = arith.constant 0 : index
    %c0_87 = arith.constant 0 : index
    %c0_88 = arith.constant 0 : index
    %168 = vector.load %arg20[%c0_85, %c0_86, %c0_87, %c0_88] : memref<1x1x1x16xf32, #tpu.memory_space<vmem>>, vector<1x1x1x16xf32>
    %169 = vector.shape_cast %168 : vector<1x1x1x16xf32> to vector<1x16xf32>
    %cst_89 = arith.constant dense<0.000000e+00> : vector<8xf32>
    %170 = vector.multi_reduction <add>, %165, %cst_89 [1] : vector<8x16xf32> to vector<8xf32>
    %171 = vector.shape_cast %170 : vector<8xf32> to vector<8x1xf32>
    %cst_90 = arith.constant 1.600000e+01 : f32
    %172 = vector.broadcast %cst_90 : f32 to vector<8x1xf32>
    %173 = arith.divf %171, %172 : vector<8x1xf32>
    %174 = vector.broadcast %173 : vector<8x1xf32> to vector<8x16xf32>
    %175 = arith.subf %165, %174 : vector<8x16xf32>
    %176 = arith.mulf %175, %175 : vector<8x16xf32>
    %cst_91 = arith.constant dense<0.000000e+00> : vector<8xf32>
    %177 = vector.multi_reduction <add>, %176, %cst_91 [1] : vector<8x16xf32> to vector<8xf32>
    %178 = vector.shape_cast %177 : vector<8xf32> to vector<8x1xf32>
    %cst_92 = arith.constant 1.600000e+01 : f32
    %179 = vector.broadcast %cst_92 : f32 to vector<8x1xf32>
    %180 = arith.divf %178, %179 : vector<8x1xf32>
    %181 = vector.broadcast %173 : vector<8x1xf32> to vector<8x16xf32>
    %182 = arith.subf %165, %181 : vector<8x16xf32>
    %cst_93 = arith.constant 9.99999974E-6 : f32
    %183 = vector.broadcast %cst_93 : f32 to vector<8x1xf32>
    %184 = arith.addf %180, %183 : vector<8x1xf32>
    %185 = math.rsqrt %184 : vector<8x1xf32>
    %186 = vector.broadcast %185 : vector<8x1xf32> to vector<8x16xf32>
    %187 = arith.mulf %182, %186 : vector<8x16xf32>
    %188 = vector.broadcast %167 : vector<1x16xf32> to vector<8x16xf32>
    %189 = arith.mulf %187, %188 : vector<8x16xf32>
    %190 = vector.broadcast %169 : vector<1x16xf32> to vector<8x16xf32>
    %191 = arith.addf %189, %190 : vector<8x16xf32>
    %c0_94 = arith.constant 0 : index
    %c0_95 = arith.constant 0 : index
    %192 = vector.load %arg25[%c0_94, %c0_95] : memref<8x16xf32, #tpu.memory_space<vmem>>, vector<8x16xf32>
    tpu.vector_store %arg25[%c0_94, %c0_95], %191 {strides = array<i32>} : memref<8x16xf32, #tpu.memory_space<vmem>>, vector<8x16xf32>,
    %c1_i32 = arith.constant 1 : i32
    %193 = arith.cmpi eq, %arg2, %c1_i32 : i32
    %194 = arith.extui %193 : i1 to i32
    %c0_i32_96 = arith.constant 0 : i32
    %195 = arith.cmpi ne, %194, %c0_i32_96 : i32
    scf.if %195 {
      %c0_97 = arith.constant 0 : index
      %c0_98 = arith.constant 0 : index
      %196 = vector.load %arg25[%c0_97, %c0_98] : memref<8x16xf32, #tpu.memory_space<vmem>>, vector<8x16xf32>
      %197 = arith.truncf %196 : vector<8x16xf32> to vector<8x16xbf16>
      %c0_99 = arith.constant 0 : index
      %c0_100 = arith.constant 0 : index
      %c0_101 = arith.constant 0 : index
      %198 = vector.load %arg7[%c0_99, %c0_100, %c0_101] : memref<1x16x32xbf16, #tpu.memory_space<vmem>>, vector<1x16x32xbf16>
      %199 = vector.shape_cast %198 : vector<1x16x32xbf16> to vector<16x32xbf16>
      %cst_102 = arith.constant dense<0.000000e+00> : vector<8x32xf32>
      %200 = tpu.matmul %197, %199, %cst_102 {dimension_numbers = #tpu.dot_dimension_numbers<[1], [0], [0], [1], [0, 0, 1, 1], [], []>} : vector<8x16xbf16>, vector<16x32xbf16>, vector<8x32xf32> -> vector<8x32xf32>
      %c0_103 = arith.constant 0 : index
      %c0_104 = arith.constant 0 : index
      %c0_105 = arith.constant 0 : index
      %201 = vector.load %arg8[%c0_103, %c0_104, %c0_105] : memref<1x1x32xf32, #tpu.memory_space<vmem>>, vector<1x1x32xf32>
      %202 = vector.shape_cast %201 : vector<1x1x32xf32> to vector<1x32xf32>
      %203 = vector.broadcast %202 : vector<1x32xf32> to vector<8x32xf32>
      %204 = arith.addf %200, %203 : vector<8x32xf32>
      %c0_106 = arith.constant 0 : index
      %c0_107 = arith.constant 0 : index
      %205 = vector.load %arg27[%c0_106, %c0_107] : memref<8x32xf32, #tpu.memory_space<vmem>>, vector<8x32xf32>
      %206 = arith.addf %205, %204 : vector<8x32xf32>
      %c0_108 = arith.constant 0 : index
      %c0_109 = arith.constant 0 : index
      %207 = vector.load %arg28[%c0_108, %c0_109] : memref<8x32xf32, #tpu.memory_space<vmem>>, vector<8x32xf32>
      tpu.vector_store %arg28[%c0_108, %c0_109], %206 {strides = array<i32>} : memref<8x32xf32, #tpu.memory_space<vmem>>, vector<8x32xf32>,
      %c1_i32_110 = arith.constant 1 : i32
      %208 = arith.cmpi eq, %arg1, %c1_i32_110 : i32
      %209 = arith.extui %208 : i1 to i32
      %c0_i32_111 = arith.constant 0 : i32
      %210 = arith.cmpi ne, %209, %c0_i32_111 : i32
      scf.if %210 {
        %c0_112 = arith.constant 0 : index
        %c0_113 = arith.constant 0 : index
        %c0_114 = arith.constant 0 : index
        %211 = vector.load %arg3[%c0_112, %c0_113, %c0_114] : memref<1x8x32xf32, #tpu.memory_space<vmem>>, vector<1x8x32xf32>
        %212 = vector.shape_cast %211 : vector<1x8x32xf32> to vector<8x32xf32>
        %c0_115 = arith.constant 0 : index
        %c0_116 = arith.constant 0 : index
        %213 = vector.load %arg28[%c0_115, %c0_116] : memref<8x32xf32, #tpu.memory_space<vmem>>, vector<8x32xf32>
        %cst_117 = arith.constant 5.000000e-01 : f32
        %214 = vector.broadcast %cst_117 : f32 to vector<8x32xf32>
        %215 = arith.mulf %214, %212 : vector<8x32xf32>
        %cst_118 = arith.constant 5.000000e-01 : f32
        %216 = vector.broadcast %cst_118 : f32 to vector<8x32xf32>
        %217 = arith.mulf %216, %213 : vector<8x32xf32>
        %218 = arith.addf %215, %217 : vector<8x32xf32>
        %c0_119 = arith.constant 0 : index
        %c0_120 = arith.constant 0 : index
        %c0_121 = arith.constant 0 : index
        %219 = vector.load %arg24[%c0_119, %c0_120, %c0_121] : memref<1x8x32xf32, #tpu.memory_space<vmem>>, vector<1x8x32xf32>
        %220 = vector.shape_cast %219 : vector<1x8x32xf32> to vector<8x32xf32>
        %221 = vector.shape_cast %218 : vector<8x32xf32> to vector<1x8x32xf32>
        tpu.vector_store %arg24[%c0_119, %c0_120, %c0_121], %221 {strides = array<i32>} : memref<1x8x32xf32, #tpu.memory_space<vmem>>, vector<1x8x32xf32>,
      } else {
      }
    } else {
    }
    return
  }
  func.func @transform_0(%arg0: i32, %arg1: i32, %arg2: i32) -> (i32, i32, i32) {
    %c0_i32 = arith.constant 0 : i32
    %c0_i32_0 = arith.constant 0 : i32
    %c0_i32_1 = arith.constant 0 : i32
    return %arg0, %c0_i32, %c0_i32_0 : i32, i32, i32
  }
  func.func @transform_1(%arg0: i32, %arg1: i32, %arg2: i32) -> (i32, i32, i32, i32) {
    %c0_i32 = arith.constant 0 : i32
    %c0_i32_0 = arith.constant 0 : i32
    %c0_i32_1 = arith.constant 0 : i32
    return %arg1, %arg0, %c0_i32, %c0_i32_0 : i32, i32, i32, i32
  }
  func.func @transform_2(%arg0: i32, %arg1: i32, %arg2: i32) -> (i32, i32, i32) {
    %c0_i32 = arith.constant 0 : i32
    %c0_i32_0 = arith.constant 0 : i32
    %c0_i32_1 = arith.constant 0 : i32
    return %arg1, %c0_i32, %c0_i32_0 : i32, i32, i32
  }
  func.func @transform_3(%arg0: i32, %arg1: i32, %arg2: i32) -> (i32, i32, i32) {
    %c0_i32 = arith.constant 0 : i32
    %c0_i32_0 = arith.constant 0 : i32
    %c0_i32_1 = arith.constant 0 : i32
    return %arg1, %c0_i32, %c0_i32_0 : i32, i32, i32
  }
  func.func @transform_4(%arg0: i32, %arg1: i32, %arg2: i32) -> (i32, i32, i32) {
    %c0_i32 = arith.constant 0 : i32
    %c0_i32_0 = arith.constant 0 : i32
    %c0_i32_1 = arith.constant 0 : i32
    return %arg1, %c0_i32, %c0_i32_0 : i32, i32, i32
  }
  func.func @transform_5(%arg0: i32, %arg1: i32, %arg2: i32) -> (i32, i32, i32) {
    %c0_i32 = arith.constant 0 : i32
    %c0_i32_0 = arith.constant 0 : i32
    %c0_i32_1 = arith.constant 0 : i32
    return %arg1, %c0_i32, %c0_i32_0 : i32, i32, i32
  }
  func.func @transform_6(%arg0: i32, %arg1: i32, %arg2: i32) -> (i32, i32, i32, i32) {
    %c0_i32 = arith.constant 0 : i32
    %c0_i32_0 = arith.constant 0 : i32
    %c0_i32_1 = arith.constant 0 : i32
    return %arg1, %arg2, %c0_i32, %c0_i32_0 : i32, i32, i32, i32
  }
  func.func @transform_7(%arg0: i32, %arg1: i32, %arg2: i32) -> (i32, i32, i32, i32) {
    %c0_i32 = arith.constant 0 : i32
    %c0_i32_0 = arith.constant 0 : i32
    %c0_i32_1 = arith.constant 0 : i32
    return %arg1, %arg2, %c0_i32, %c0_i32_0 : i32, i32, i32, i32
  }
  func.func @transform_8(%arg0: i32, %arg1: i32, %arg2: i32) -> (i32, i32, i32, i32) {
    %c0_i32 = arith.constant 0 : i32
    %c0_i32_0 = arith.constant 0 : i32
    %c0_i32_1 = arith.constant 0 : i32
    return %arg1, %arg2, %c0_i32, %c0_i32_0 : i32, i32, i32, i32
  }
  func.func @transform_9(%arg0: i32, %arg1: i32, %arg2: i32) -> (i32, i32, i32, i32) {
    %c0_i32 = arith.constant 0 : i32
    %c0_i32_0 = arith.constant 0 : i32
    %c0_i32_1 = arith.constant 0 : i32
    return %arg1, %arg2, %c0_i32, %c0_i32_0 : i32, i32, i32, i32
  }
  func.func @transform_10(%arg0: i32, %arg1: i32, %arg2: i32) -> (i32, i32, i32, i32) {
    %c0_i32 = arith.constant 0 : i32
    %c0_i32_0 = arith.constant 0 : i32
    %c0_i32_1 = arith.constant 0 : i32
    return %arg1, %arg2, %c0_i32, %c0_i32_0 : i32, i32, i32, i32
  }
  func.func @transform_11(%arg0: i32, %arg1: i32, %arg2: i32) -> (i32, i32, i32, i32) {
    %c0_i32 = arith.constant 0 : i32
    %c0_i32_0 = arith.constant 0 : i32
    %c0_i32_1 = arith.constant 0 : i32
    return %arg1, %arg2, %c0_i32, %c0_i32_0 : i32, i32, i32, i32
  }
  func.func @transform_12(%arg0: i32, %arg1: i32, %arg2: i32) -> (i32, i32, i32, i32) {
    %c0_i32 = arith.constant 0 : i32
    %c0_i32_0 = arith.constant 0 : i32
    %c0_i32_1 = arith.constant 0 : i32
    return %arg1, %arg2, %c0_i32, %c0_i32_0 : i32, i32, i32, i32
  }
  func.func @transform_13(%arg0: i32, %arg1: i32, %arg2: i32) -> (i32, i32, i32, i32) {
    %c0_i32 = arith.constant 0 : i32
    %c0_i32_0 = arith.constant 0 : i32
    %c0_i32_1 = arith.constant 0 : i32
    return %arg1, %arg2, %c0_i32, %c0_i32_0 : i32, i32, i32, i32
  }
  func.func @transform_14(%arg0: i32, %arg1: i32, %arg2: i32) -> (i32, i32, i32, i32) {
    %c0_i32 = arith.constant 0 : i32
    %c0_i32_0 = arith.constant 0 : i32
    %c0_i32_1 = arith.constant 0 : i32
    return %arg1, %arg2, %c0_i32, %c0_i32_0 : i32, i32, i32, i32
  }
  func.func @transform_15(%arg0: i32, %arg1: i32, %arg2: i32) -> (i32, i32, i32, i32) {
    %c0_i32 = arith.constant 0 : i32
    %c0_i32_0 = arith.constant 0 : i32
    %c0_i32_1 = arith.constant 0 : i32
    return %arg1, %arg2, %c0_i32, %c0_i32_0 : i32, i32, i32, i32
  }
  func.func @transform_16(%arg0: i32, %arg1: i32, %arg2: i32) -> (i32, i32, i32, i32) {
    %c0_i32 = arith.constant 0 : i32
    %c0_i32_0 = arith.constant 0 : i32
    %c0_i32_1 = arith.constant 0 : i32
    return %arg1, %arg2, %c0_i32, %c0_i32_0 : i32, i32, i32, i32
  }
  func.func @transform_17(%arg0: i32, %arg1: i32, %arg2: i32) -> (i32, i32, i32, i32) {
    %c0_i32 = arith.constant 0 : i32
    %c0_i32_0 = arith.constant 0 : i32
    %c0_i32_1 = arith.constant 0 : i32
    return %arg1, %arg2, %c0_i32, %c0_i32_0 : i32, i32, i32, i32
  }
  func.func @transform_18(%arg0: i32, %arg1: i32, %arg2: i32) -> (i32, i32) {
    %c0_i32 = arith.constant 0 : i32
    %c0_i32_0 = arith.constant 0 : i32
    %c0_i32_1 = arith.constant 0 : i32
    return %c0_i32, %c0_i32_0 : i32, i32
  }
  func.func @transform_19(%arg0: i32, %arg1: i32, %arg2: i32) -> (i32, i32) {
    %c0_i32 = arith.constant 0 : i32
    %c0_i32_0 = arith.constant 0 : i32
    %c0_i32_1 = arith.constant 0 : i32
    return %c0_i32, %c0_i32_0 : i32, i32
  }
  func.func @transform_20(%arg0: i32, %arg1: i32, %arg2: i32) -> (i32, i32) {
    %c0_i32 = arith.constant 0 : i32
    %c0_i32_0 = arith.constant 0 : i32
    %c0_i32_1 = arith.constant 0 : i32
    return %c0_i32, %c0_i32_0 : i32, i32
  }
  func.func @transform_21(%arg0: i32, %arg1: i32, %arg2: i32) -> (i32, i32, i32) {
    %c0_i32 = arith.constant 0 : i32
    %c0_i32_0 = arith.constant 0 : i32
    %c0_i32_1 = arith.constant 0 : i32
    return %arg0, %c0_i32, %c0_i32_0 : i32, i32, i32
  }
}

</mosaic_0001>

<bundles_post_ra>
// kernel: tpu_custom_call.1
= control target key start
LH: loop header
LB: loop body
LE: loop exit
PB: predicated region body
PF: predicated region fallthrough
CT: control target
= control target key end

     0   :  { %s4150_s0 = inlined_call_operand.vmem [shape: f32[2,8,32], index: 0, kind: input, shape index: {}]   ;;  %s4151_s1 = inlined_call_operand.vmem [shape: f32[2,2,8,32], index: 1, kind: input, shape index: {}]   ;;  %s4152_s2 = inlined_call_operand.vmem [shape: bf16[2,32,16], index: 2, kind: input, shape index: {}]   ;;  %s4153_s3 = inlined_call_operand.hbm [shape: f32[2,1,16], index: 3, kind: input, shape index: {}]   ;;  %s4154_s4 = inlined_call_operand.vmem [shape: bf16[2,16,32], index: 4, kind: input, shape index: {}]   ;;  %s4155_s5 = inlined_call_operand.hbm [shape: f32[2,1,32], index: 5, kind: input, shape index: {}]   ;;  %s4156_s6 = inlined_call_operand.vmem [shape: bf16[2,2,16,48], index: 6, kind: input, shape index: {}]   ;;  %s4157_s7 = inlined_call_operand.hbm [shape: f32[2,2,1,48], index: 7, kind: input, shape index: {}]   ;;  %s4158_s8 = inlined_call_operand.vmem [shape: bf16[2,2,16,16], index: 8, kind: input, shape index: {}]   ;;  %s4159_s9 = inlined_call_operand.hbm [shape: f32[2,2,1,16], index: 9, kind: input, shape index: {}]   ;;  %s4160_s10 = inlined_call_operand.hbm [shape: f32[2,2,1,16], index: 10, kind: input, shape index: {}]   ;;  %s4161_s11 = inlined_call_operand.hbm [shape: f32[2,2,1,16], index: 11, kind: input, shape index: {}]   ;;  %s4162_s12 = inlined_call_operand.vmem [shape: bf16[2,2,16,64], index: 12, kind: input, shape index: {}]   ;;  %s4163_s13 = inlined_call_operand.vmem [shape: f32[2,2,1,64], index: 13, kind: input, shape index: {}]   ;;  %s4164_s14 = inlined_call_operand.vmem [shape: bf16[2,2,64,16], index: 14, kind: input, shape index: {}]   ;;  %s4165_s15 = inlined_call_operand.vmem [shape: f32[2,2,1,16], index: 15, kind: input, shape index: {}]   ;;  %s4166_s16 = inlined_call_operand.vmem [shape: f32[2,2,1,16], index: 16, kind: input, shape index: {}]   ;;  %s4167_s17 = inlined_call_operand.hbm [shape: f32[2,2,1,16], index: 17, kind: input, shape index: {}]   ;;  %s4168_s18 = inlined_call_operand.vmem [shape: bf16[32,32], index: 18, kind: input, shape index: {}]   ;;  %s4169_s19 = inlined_call_operand.vmem [shape: bf16[32,32], index: 19, kind: input, shape index: {}]   ;;  %s4170_s20 = inlined_call_operand.vmem [shape: f32[1,32], index: 20, kind: input, shape index: {}]   ;;  %s4171_s21 = inlined_call_operand.hbm [shape: f32[2,8,32], index: 21, kind: output, shape index: {}]  }
   0x1   :  { %4208 = sst [smem:[#allocation53_spill]] %s4150_s0 }
   0x2   :  { %4209 = sst [smem:[#allocation54_spill]] %s4151_s1 }
   0x3   :  { %4210 = sst [smem:[#allocation55_spill]] %s4152_s2 }
   0x4   :  { %4211 = sst [smem:[#allocation56_spill]] %s4153_s3 }
   0x5   :  { %4212 = sst [smem:[#allocation57_spill]] %s4154_s4 }
   0x6   :  { %4213 = sst [smem:[#allocation58_spill]] %s4155_s5 }
   0x7   :  { %4214 = sst [smem:[#allocation59_spill]] %s4156_s6 }
   0x8   :  { %4215 = sst [smem:[#allocation60_spill]] %s4157_s7 }
   0x9   :  { %4216 = sst [smem:[#allocation61_spill]] %s4158_s8 }
   0xa   :  { %4217 = sst [smem:[#allocation62_spill]] %s4159_s9 }
   0xb   :  { %4218 = sst [smem:[#allocation63_spill]] %s4160_s10 }
   0xc   :  { %4219 = sst [smem:[#allocation64_spill]] %s4161_s11 }
   0xd   :  { %4220 = sst [smem:[#allocation65_spill]] %s4162_s12 }
   0xe   :  { %4221 = sst [smem:[#allocation66_spill]] %s4163_s13 }
   0xf   :  { %4222 = sst [smem:[#allocation67_spill]] %s4164_s14 }
  0x10   :  { %4223 = sst [smem:[#allocation68_spill]] %s4165_s15 }
  0x11   :  { %4224 = sst [smem:[#allocation69_spill]] %s4166_s16 }
  0x12   :  { %4225 = sst [smem:[#allocation70_spill]] %s4167_s17 }
  0x13   :  { %4226 = sst [smem:[#allocation71_spill]] %s4171_s21 }
  0x14   :  { %26 = vsyncpa [#allocation7], 0 }
  0x15   :  { %28 = vsyncpa [#allocation7 + $0x1], 0 }
  0x16   :  { %29 = vsyncpa [#allocation10], 0 }
  0x17   :  { %31 = vsyncpa [#allocation10 + $0x1], 0 }
  0x18   :  { %32 = vsyncpa [#allocation13], 0 }
  0x19   :  { %34 = vsyncpa [#allocation13 + $0x1], 0 }
  0x1a   :  { %35 = vsyncpa [#allocation16], 0 }
  0x1b   :  { %37 = vsyncpa [#allocation16 + $0x1], 0 }
  0x1c   :  { %38 = vsyncpa [#allocation8], 0 }
  0x1d   :  { %40 = vsyncpa [#allocation8 + $0x1], 0  ;;  %s3523_s18 = smov 0   ;;  %s3525_s2 = smov 0  }
  0x1e   :  { %s3527_s19 = smov 0   ;;  %s3529_s20 = smov 0  }
  0x1f   :  { %s3531_s25 = smov 0   ;;  %s3533_s26 = smov 0  }
  0x20   :  { %s3535_s27 = smov 0   ;;  %s3537_s3 = smov 0  }
  0x21   :  { %s3539_s28 = smov 0   ;;  %s3541_s29 = smov 0  }
  0x22   :  { %s3543_s0 = smov 0   ;;  %s3545_s4 = smov 0  }
  0x23   :  { %s3547_s30 = smov 0   ;;  %s3549_s5 = smov 0  }
  0x24   :  { %s3551_s22 = smov 0   ;;  %s3553_s23 = smov 0  }
  0x25 LB: > { %4227 = sst [smem:[#allocation25_spill]] %s3322_s18  ;;  %s3600_s1 = sadd.s32 4294967295, %s3382_s23   ;;  %s3382_s23 = sphi %s3553_s23, %s46_s23   ;;  %s3378_s22 = sphi %s3551_s22, %s4346_s22   ;;  %s3374_s5 = sphi %s3549_s5, %s4345_s5   ;;  %s3370_s30 = sphi %s3547_s30, %s4344_s30   ;;  %s3366_s4 = sphi %s3545_s4, %s4343_s4   ;;  %s3362_s0 = sphi %s3543_s0, %s4342_s0   ;;  %s3358_s29 = sphi %s3541_s29, %s4341_s29   ;;  %s3354_s28 = sphi %s3539_s28, %s4340_s28   ;;  %s3350_s3 = sphi %s3537_s3, %s4339_s3   ;;  %s3346_s27 = sphi %s3535_s27, %s4338_s27   ;;  %s3342_s26 = sphi %s3533_s26, %s4337_s26   ;;  %s3338_s25 = sphi %s3531_s25, %s4336_s25   ;;  %s3334_s20 = sphi %s3529_s20, %s4348_s20   ;;  %s3330_s19 = sphi %s3527_s19, %s4334_s19   ;;  %s3326_s2 = sphi %s3525_s2, %s4333_s2   ;;  %s3322_s18 = sphi %s3523_s18, %s4332_s18  }
  0x26   : > { %4228 = sst [smem:[#allocation26_spill]] %s3326_s2  ;;  %s2578_s24 = sadd.s32 4294967294, %s3382_s23  }
  0x27   : > { %4229 = sst [smem:[#allocation27_spill]] %s3330_s19  ;;  %p159_p0 = scmp.ne.s32.totalorder %s3354_s28, %s3350_s3 }
  0x28   : > { %4230 = sst [smem:[#allocation28_spill]] %s3338_s25  ;;  %p160_p1 = scmp.eq.s32.totalorder %s3382_s23, 0 }
  0x29   : > { %4231 = sst [smem:[#allocation29_spill]] %s3342_s26  ;;  %p165_p2 = scmp.ne.s32.totalorder %s3350_s3, %s3346_s27 }
  0x2a   : > { %4232 = sst [smem:[#allocation30_spill]] %s3350_s3  ;;  %p166_p3 = scmp.eq.s32.totalorder %s3600_s1, 0 }
  0x2b   : > { %4233 = sst [smem:[#allocation31_spill]] %s3354_s28  ;;  %p3610_p4 = por %p160_p1, %p159_p0 }
  0x2c   : > { %4234 = sst [smem:[#allocation32_spill]] %s3358_s29  ;;  %p267_p5 = scmp.ne.s32.totalorder %s3342_s26, %s3338_s25 }
  0x2d   : > { %4235 = sst [smem:[#allocation33_spill]] %s3362_s0  ;;  %p3616_p6 = por %p166_p3, %p165_p2 }
  0x2e   : > { %4236 = sst [smem:[#allocation34_spill]] %s3366_s4  ;;  %p273_p7 = scmp.ne.s32.totalorder %s3338_s25, %s3334_s20 }
  0x2f   : > { %4237 = sst [smem:[#allocation35_spill]] %s3370_s30  ;;  %p3621_p8 = por %p267_p5, %p160_p1 }
  0x30   : > { %4238 = sst [smem:[#allocation36_spill]] %s3374_s5  ;;  %p3626_p9 = por %p273_p7, %p166_p3 }
  0x31   : > { %4239 = sst [smem:[#allocation37_spill]] %s3378_s22  ;;  %p639_p10 = scmp.ne.s32.totalorder %s3330_s19, %s3326_s2 }
  0x32   : > { %4240 = sst [smem:[#allocation38_spill]] %s3382_s23  ;;  %p640_p11 = scmp.eq.s32.totalorder %s3600_s1, 7 }
  0x33   : > { %4241 = sst [smem:[#allocation39_spill]] %s3600_s1  ;;  %p645_p12 = scmp.ne.s32.totalorder %s3326_s2, %s3322_s18 }
  0x34   : > { %s4243_s15 = scalar_select %p3616_p6, 1, 0 }
  0x35   : > { %s4246_s21 = scalar_select %p3626_p9, 1, 0 }
  0x36   : > { %4244 = sst [smem:[#allocation40_spill]] %s4243_s15  ;;  %p646_p13 = scmp.eq.s32.totalorder %s2578_s24, 7 }
  0x37   : > { %4247 = sst [smem:[#allocation41_spill]] %s4246_s21  ;;  %p3635_p0 = por %p640_p11, %p639_p10 }
  0x38   : > { %p2827_p2 = scmp.lt.s32.totalorder %s3382_s23, 8  ;;  %p3640_p6 = por %p646_p13, %p645_p12 }
  0x39   : > { %s4248_s12 = scalar_select %p3635_p0, 1, 0 }
  0x3a   : > { %s4250_s20 = scalar_select %p3640_p6, 1, 0 }
  0x3b   : > { %4249 = sst [smem:[#allocation42_spill]] %s4248_s12  ;;  %s3645_s8 = sand.u32 1, %s3354_s28  }
  0x3c   : > { %4251 = sst [smem:[#allocation43_spill]] %s4250_s20  ;;  %s4183_s27 = sshll.u32 %s3374_s5, 4 }
  0x3d   : > { %p3650_p1 = pnand %p2827_p2, %p3610_p4  ;;  %s3655_s24 = sand.u32 1, %s3382_s23  }
  0x3e   : > { %s4253_s13 = sld [smem:[#allocation58_spill]]  ;;  %s729_s20 = scalar_lea.vmem [#allocation9], %s3645_s8 }
  0x3f   : > { %s736_s0 = sshll.u32 %s729_s20, 4  ;;  %p3665_p3 = pnand %p2827_p2, %p3621_p8  ;;  %s737_s0 = int_to_ptr.vmem [resolvable:$true] %s736_s0 }
  0x40   : > { %s4184_s4 = scalar_lea.sflag [#allocation10], %s3655_s24  ;;  %p4197_p4 = pneg %p3650_p1 }
  0x41   : > { %s3023_s2 = scalar_lea.vmem %s737_s0, 16  ;;  %s3384_s12 = smov [#allocation9]  }
  0x42   : > { %p3024_p5 = scmp.ne.s32.totalorder %s737_s0, %s3023_s2  ;;  %s3028_s18 = sshll.u32 %s3384_s12, 4  ;;  %s3029_s18 = int_to_ptr.vmem [resolvable:$false] %s3028_s18 }
  0x43   : > { %p3031_p11 = scmp.lt.s32.totalorder %s737_s0, %s3029_s18 }
  0x44   : > { %s734_s29 = scalar_lea.hbm %s4253_s13, %s4183_s27  ;;  %p3026_p7 = pnand %p3024_p5, %p4197_p4 }
  0x45   : > { %s3030_s13 = scalar_lea.vmem %s3029_s18, 32 }
  0x46   : > { %p3027_p10 = pneg %p3026_p7  ;;  %p3032_p12 = scmp.lt.s32.totalorder %s3030_s13, %s3023_s2 }
  0x48   : > { %p3033_p13 = por %p3032_p12, %p3031_p11 }
  0x4a   : > { %p3034_p8 = pnand %p3033_p13, %p3027_p10 }
  0x4c   : > { %3037 = shalt.err (!%p3034_p8)
}
  0x4d   : > { %2807 = dma.hbm_to_vmem [thread:$0]  (!%p3650_p1), %s734_s29, 16, %s737_s0, %s4184_s4  }
  0x4e   : > { %p2593_p2 = scmp.ge.s32.totalorder %s3382_s23, 1  ;;  %p914_p5 = scmp.lt.s32.totalorder %s3382_s23, 9 }
  0x4f   : > { %s58_s2 = sadd.s32 1, %s3370_s30  ;;  %s65_s20 = sadd.s32 1, %s3378_s22 }
  0x50   : > { %p3681_p7 = pnand %p2593_p2, %p914_p5  ;;  %p59_p10 = scmp.ge.s32.totalorder %s58_s2, 2 }
  0x51   : > { %s260_s12 = sadd.s32 1, %s3342_s26  ;;  %s3689_s18 = sand.u32 1, %s3342_s26  }
  0x52   : > { %s2583_s13 = sshll.u32 %s3374_s5, 1  ;;  %s4350_s2 = smov (%p59_p10, %s58_s2), 0 }
  0x53   : > { %4256 = sst [smem:[#allocation44_spill]] %s4350_s2  ;;  %s4257_s27 = sadd.s32 1, %s3374_s5 }
  0x54   : > { %s4352_s27 = smov (!%p59_p10, %s4257_s27), %s3374_s5  ;;  %s256_s29 = ssub.s32 %s3370_s30, %s4350_s2 }
  0x55   : > { %s763_s0 = sadd.s32 %s3370_s30, %s2583_s13  ;;  %p63_p11 = scmp.ge.s32.totalorder %s4352_s27, 2 }
  0x56   : > { %s3700_s4 = sshll.u32 %s763_s0, 4  ;;  %s4259_s9 = sld [smem:[#allocation62_spill]] }
  0x57   : > { %s4354_s27 = smov (%p63_p11, %s4352_s27), 0  ;;  %s4356_s20 = smov (!%p63_p11, %s65_s20), %s3378_s22 }
  0x58   : > { %4258 = sst [smem:[#allocation45_spill]] %s4354_s27  ;;  %s149_s23 = ssub.s32 %s3374_s5, %s4354_s27 }
  0x59   : > { %p67_p12 = scmp.ge.s32.totalorder %s4356_s20, 2  ;;  %p150_p13 = scmp.eq.s32.totalorder %s149_s23, 0 }
  0x5a   : > { %s257_s13 = sor.u32 %s256_s29, %s149_s23  ;;  %s789_s0 = scalar_lea.vmem [#allocation12], %s3689_s18 }
  0x5b   : > { %s798_s30 = sshll.u32 %s789_s0, 4  ;;  %s4358_s20 = smov (%p67_p12, %s4356_s20), 0  ;;  %s799_s30 = int_to_ptr.vmem [resolvable:$true] %s798_s30 }
  0x5c   : > { %4260 = sst [smem:[#allocation46_spill]] %s4358_s20  ;;  %s4261_s1 = sadd.s32 1, %s3354_s28 }
  0x5d   : > { %s3717_s15 = scalar_select %p150_p13, %s3354_s28, %s4261_s1  }
  0x5e   : > { %p258_p8 = scmp.eq.s32.totalorder %s257_s13, 0  ;;  %s626_s3 = ssub.s32 %s3378_s22, %s4358_s20 }
  0x5f   : > { %4262 = sst [smem:[#allocation47_spill]] %s3717_s15  ;;  %p627_p2 = scmp.eq.s32.totalorder %s626_s3, 0 }
  0x60   : > { %s3722_s27 = scalar_select %p258_p8, %s3342_s26, %s260_s12  }
  0x61   : > { %s4264_s21 = sadd.s32 1, %s3330_s19  ;;  %s4200_s2 = scalar_lea.sflag [#allocation13], %s3655_s24 }
  0x62   : > { %4263 = sst [smem:[#allocation48_spill]] %s3722_s27  ;;  %p3732_p5 = pneg %p3665_p3 }
  0x63   : > { %s3727_s25 = scalar_select %p627_p2, %s3330_s19, %s4264_s21  }
  0x64   : > { %s3051_s29 = scalar_lea.vmem %s799_s30, 16  ;;  %s3385_s1 = smov [#allocation12]  }
  0x65   : > { %4265 = sst [smem:[#allocation49_spill]] %s3727_s25  ;;  %p3052_p10 = scmp.ne.s32.totalorder %s799_s30, %s3051_s29 }
  0x66   : > { %s3056_s3 = sshll.u32 %s3385_s1, 4  ;;  %s3057_s3 = int_to_ptr.vmem [resolvable:$false] %s3056_s3 }
  0x67   : > { %p3054_p11 = pnand %p3052_p10, %p3732_p5  ;;  %s3058_s12 = scalar_lea.vmem %s3057_s3, 32 }
  0x68   : > { %p3059_p13 = scmp.lt.s32.totalorder %s799_s30, %s3057_s3  ;;  %p3060_p8 = scmp.lt.s32.totalorder %s3058_s12, %s3051_s29 }
  0x69   : > { %p3055_p12 = pneg %p3054_p11 }
  0x6a   : > { %p3061_p2 = por %p3060_p8, %p3059_p13 }
  0x6c   : > { %p3062_p4 = pnand %p3061_p2, %p3055_p12 }
  0x6e   : > { %3065 = shalt.err (!%p3062_p4)
}
  0x6f   : > { %s4267_s21 = scalar_lea.hbm %s4259_s9, %s3700_s4  ;;  %s4268_s11 = sld [smem:[#allocation64_spill]] }
  0x70   : > { %2813 = dma.hbm_to_vmem [thread:$0]  (!%p3665_p3), %s4267_s21, 16, %s799_s30, %s4200_s2  }
  0x71   : > { %s827_s12 = scalar_lea.vmem [#allocation15], %s3689_s18  ;;  %s4202_s22 = scalar_lea.sflag [#allocation16], %s3655_s24 }
  0x72   : > { %s836_s20 = sshll.u32 %s827_s12, 4  ;;  %s3386_s13 = smov [#allocation15]   ;;  %s837_s20 = int_to_ptr.vmem [resolvable:$true] %s836_s20 }
  0x73   : > { %s3079_s15 = scalar_lea.vmem %s837_s20, 16  ;;  %s3084_s0 = sshll.u32 %s3386_s13, 4  ;;  %s3085_s0 = int_to_ptr.vmem [resolvable:$false] %s3084_s0 }
  0x74   : > { %p3080_p4 = scmp.ne.s32.totalorder %s837_s20, %s3079_s15  ;;  %s3086_s9 = scalar_lea.vmem %s3085_s0, 32 }
  0x75   : > { %s834_s29 = scalar_lea.hbm %s4268_s11, %s3700_s4  ;;  %p3087_p12 = scmp.lt.s32.totalorder %s837_s20, %s3085_s0 }
  0x76   : > { %p3082_p10 = pnand %p3080_p4, %p3732_p5  ;;  %p3088_p13 = scmp.lt.s32.totalorder %s3086_s9, %s3079_s15 }
  0x78   : > { %p3083_p11 = pneg %p3082_p10  ;;  %p3089_p8 = por %p3088_p13, %p3087_p12 }
  0x7a   : > { %p3090_p2 = pnand %p3089_p8, %p3083_p11 }
  0x7c   : > { %3093 = shalt.err (!%p3090_p2)
}
  0x7d   : > { %2819 = dma.hbm_to_vmem [thread:$0]  (!%p3665_p3), %s834_s29, 16, %s837_s20, %s4202_s22  }
  0x7e   : > { %s4269_s30 = sshll.u32 %s3374_s5, 4  ;;  %s4270_s3 = sld [smem:[#allocation56_spill]] }
  0x7f   : > { %s704_s13 = scalar_lea.vmem [#allocation6], %s3645_s8  ;;  %s4271_s7 = sld [smem:[#allocation60_spill]] }
  0x80   : > { %s711_s9 = sshll.u32 %s704_s13, 4  ;;  %s702_s11 = scalar_lea.sflag [#allocation7], %s3645_s8  ;;  %s712_s9 = int_to_ptr.vmem [resolvable:$true] %s711_s9 }
  0x81   : > { %s3107_s28 = scalar_lea.vmem %s712_s9, 16  ;;  %p4272_p10 = pneg %p3650_p1 }
  0x82   : > { %p3108_p4 = scmp.ne.s32.totalorder %s712_s9, %s3107_s28  ;;  %s3387_s20 = smov [#allocation6]  }
  0x83   : > { %s3112_s29 = sshll.u32 %s3387_s20, 4  ;;  %s3113_s29 = int_to_ptr.vmem [resolvable:$false] %s3112_s29 }
  0x84   : > { %s709_s12 = scalar_lea.hbm %s4270_s3, %s4269_s30  ;;  %p3110_p11 = pnand %p3108_p4, %p4272_p10 }
  0x85   : > { %s765_s2 = scalar_lea.hbm %s4271_s7, %s3700_s4  ;;  %s3114_s22 = scalar_lea.vmem %s3113_s29, 32 }
  0x86   : > { %p3111_p12 = pneg %p3110_p11  ;;  %p3115_p13 = scmp.lt.s32.totalorder %s712_s9, %s3113_s29 }
  0x87   : > { %p3116_p8 = scmp.lt.s32.totalorder %s3114_s22, %s3107_s28 }
  0x89   : > { %p3117_p2 = por %p3116_p8, %p3115_p13 }
  0x8b   : > { %p3118_p6 = pnand %p3117_p2, %p3111_p12 }
  0x8d   : > { %3121 = shalt.err (!%p3118_p6)
}
  0x8e   : > { %2804 = dma.hbm_to_vmem [thread:$0]  (!%p3650_p1), %s709_s12, 16, %s712_s9, %s702_s11  }
  0x8f   : > { %s758_s8 = scalar_lea.vmem [#allocation11], %s3689_s18  ;;  %s4273_s10 = sld [smem:[#allocation63_spill]] }
  0x90   : > { %s767_s30 = sshll.u32 %s758_s8, 4  ;;  %s3388_s28 = smov [#allocation11]   ;;  %s768_s30 = int_to_ptr.vmem [resolvable:$true] %s767_s30 }
  0x91   : > { %s3135_s13 = scalar_lea.vmem %s768_s30, 16  ;;  %s3140_s22 = sshll.u32 %s3388_s28, 4  ;;  %s3141_s22 = int_to_ptr.vmem [resolvable:$false] %s3140_s22 }
  0x92   : > { %p3136_p4 = scmp.ne.s32.totalorder %s768_s30, %s3135_s13  ;;  %s3142_s6 = scalar_lea.vmem %s3141_s22, 32 }
  0x93   : > { %p3143_p6 = scmp.lt.s32.totalorder %s768_s30, %s3141_s22  ;;  %p3144_p12 = scmp.lt.s32.totalorder %s3142_s6, %s3135_s13 }
  0x94   : > { %p3138_p10 = pnand %p3136_p4, %p3732_p5 }
  0x95   : > { %s815_s3 = scalar_lea.hbm %s4273_s10, %s3700_s4  ;;  %p3145_p13 = por %p3144_p12, %p3143_p6 }
  0x96   : > { %p3139_p11 = pneg %p3138_p10 }
  0x98   : > { %p3146_p1 = pnand %p3145_p13, %p3139_p11 }
  0x9a   : > { %3149 = shalt.err (!%p3146_p1)
}
  0x9b   : > { %s4274_s11 = scalar_lea.sflag [#allocation10], %s3655_s24  ;;  %s808_s15 = scalar_lea.vmem [#allocation14], %s3689_s18 }
  0x9c   : > { %2810 = dma.hbm_to_vmem [thread:$0]  (!%p3665_p3), %s765_s2, 16, %s768_s30, %s4274_s11  }
  0x9d   : > { %s817_s0 = sshll.u32 %s808_s15, 4  ;;  %s4275_s17 = sld [smem:[#allocation70_spill]]  ;;  %s818_s0 = int_to_ptr.vmem [resolvable:$true] %s817_s0 }
  0x9e   : > { %s3163_s21 = scalar_lea.vmem %s818_s0, 16  ;;  %s3389_s1 = smov [#allocation14]  }
  0x9f   : > { %p3164_p8 = scmp.ne.s32.totalorder %s818_s0, %s3163_s21  ;;  %s3168_s13 = sshll.u32 %s3389_s1, 4  ;;  %s3169_s13 = int_to_ptr.vmem [resolvable:$false] %s3168_s13 }
  0xa0   : > { %s3170_s28 = scalar_lea.vmem %s3169_s13, 32  ;;  %p3171_p10 = scmp.lt.s32.totalorder %s818_s0, %s3169_s13 }
  0xa1   : > { %p3166_p2 = pnand %p3164_p8, %p3732_p5  ;;  %p3172_p11 = scmp.lt.s32.totalorder %s3170_s28, %s3163_s21 }
  0xa3   : > { %s907_s8 = scalar_lea.hbm %s4275_s17, %s3700_s4  ;;  %p3167_p4 = pneg %p3166_p2 }
  0xa4   : > { %p3173_p6 = por %p3172_p11, %p3171_p10 }
  0xa6   : > { %p3174_p12 = pnand %p3173_p6, %p3167_p4 }
  0xa8   : > { %3177 = shalt.err (!%p3174_p12)
}
  0xa9   : > { %s4276_s2 = scalar_lea.sflag [#allocation13], %s3655_s24  ;;  %s900_s6 = scalar_lea.vmem [#allocation17], %s3689_s18 }
  0xaa   : > { %2816 = dma.hbm_to_vmem [thread:$0]  (!%p3665_p3), %s815_s3, 16, %s818_s0, %s4276_s2  }
  0xab   : > { %s909_s11 = sshll.u32 %s900_s6, 4  ;;  %s3390_s9 = smov [#allocation17]   ;;  %s910_s11 = int_to_ptr.vmem [resolvable:$true] %s909_s11 }
  0xac   : > { %s3191_s12 = scalar_lea.vmem %s910_s11, 16  ;;  %s3196_s15 = sshll.u32 %s3390_s9, 4  ;;  %s3197_s15 = int_to_ptr.vmem [resolvable:$false] %s3196_s15 }
  0xad   : > { %p3192_p13 = scmp.ne.s32.totalorder %s910_s11, %s3191_s12  ;;  %s3198_s20 = scalar_lea.vmem %s3197_s15, 32 }
  0xae   : > { %p3199_p2 = scmp.lt.s32.totalorder %s910_s11, %s3197_s15  ;;  %p3200_p4 = scmp.lt.s32.totalorder %s3198_s20, %s3191_s12 }
  0xaf   : > { %p3194_p1 = pnand %p3192_p13, %p3732_p5 }
  0xb0   : > { %p3201_p10 = por %p3200_p4, %p3199_p2 }
  0xb1   : > { %p3195_p8 = pneg %p3194_p1 }
  0xb3   : > { %p3202_p11 = pnand %p3201_p10, %p3195_p8 }
  0xb5   : > { %3205 = shalt.err (!%p3202_p11)
}
  0xb6   : > { %s4277_s18 = scalar_lea.sflag [#allocation16], %s3655_s24  ;;  %918 = sbr.rel (%p3681_p7) target bundleno = 3163 (0xc5b), region = 104 }
  0xb7   : > { %2822 = dma.hbm_to_vmem [thread:$0]  (!%p3665_p3), %s907_s8, 16, %s910_s11, %s4277_s18  }
  0xbb   : > { %s4278_s23 = sld [smem:[#allocation30_spill]] }
  0xbc   : > { %s4279_s29 = sld [smem:[#allocation40_spill]] }
  0xc1   : > { %s3822_s21 = sand.u32 1, %s4278_s23  }
  0xc2   : > { %4280 = sst [smem:[#allocation50_spill]] %s3822_s21  ;;  %s921_s1 = scalar_lea.sflag [#allocation7], %s3822_s21 }
  0xc3   : > { %p4281_p5 = scmp.ne.s32.totalorder %s4279_s29, 0 }
  0xc5   : > { %3297 = dma.done.wait (%p4281_p5), %s921_s1, 16  }
  0xc6   : > { %3299 = vsyncadd (%p4281_p5), %s921_s1, 4294967280  ;;  %s4282_s24 = sld [smem:[#allocation39_spill]] }
  0xcc   : > { %s928_s4 = sand.u32 1, %s4282_s24  }
  0xcd   : > { %s929_s14 = scalar_lea.sflag [#allocation10], %s928_s4 }
  0xce   : > { %3301 = dma.done.wait (%p4281_p5), %s929_s14, 16  }
  0xcf   : > { %3303 = vsyncadd (%p4281_p5), %s929_s14, 4294967280  ;;  %s4283_s8 = sld [smem:[#allocation28_spill]] }
  0xd5   : > { %s3837_s2 = sand.u32 1, %s4283_s8  }
  0xd6   : > { %3305 = dma.done.wait (%p3626_p9), %s929_s14, 16  }
  0xd7   : > { %3307 = vsyncadd (%p3626_p9), %s929_s14, 4294967280  ;;  %s945_s22 = scalar_lea.sflag [#allocation13], %s928_s4 }
  0xd8   : > { %3309 = dma.done.wait (%p3626_p9), %s945_s22, 32  }
  0xd9   : > { %3311 = vsyncadd (%p3626_p9), %s945_s22, 4294967264  ;;  %s961_s12 = scalar_lea.sflag [#allocation16], %s928_s4 }
  0xda   : > { %3313 = dma.done.wait (%p3626_p9), %s961_s12, 32  }
  0xdb   : > { %3315 = vsyncadd (%p3626_p9), %s961_s12, 4294967264  ;;  %s4285_s15 = sld [smem:[#allocation26_spill]] }
  0xdc   : > { %s4286_s20 = sld [smem:[#allocation34_spill]] }
  0xdd   : > { %s4287_s18 = sld [smem:[#allocation33_spill]] }
  0xde   : > { %s4288_s3 = sld [smem:[#allocation32_spill]] }
  0xdf   : > { %s4289_s4 = sld [smem:[#allocation53_spill]] }
  0xe0   : > { %s4292_s30 = sld [smem:[#allocation54_spill]] }
  0xe1   : > { %s4203_s0 = sand.u32 1, %s4285_s15   ;;  %s4293_s1 = sld [smem:[#allocation57_spill]] }
  0xe2   : > { %s3858_s23 = sshll.u32 %s4203_s0, 3  ;;  %p1132_p3 = scmp.lt.s32.totalorder %s4286_s20, 1 }
  0xe3   : > { %p1136_p7 = scmp.lt.s32.totalorder %s4287_s18, 1  ;;  %s4291_s0 = sld [smem:[#allocation55_spill]] }
  0xe4   : > { %s4360_s20 = smov (!%p1132_p3, %s4286_s20), 1  ;;  %p1156_p6 = scmp.lt.s32.totalorder %s4288_s3, 1 }
  0xe5   : > { %s4362_s18 = smov (!%p1136_p7, %s4287_s18), 1  ;;  %s2595_s29 = sshll.u32 %s4360_s20, 3 }
  0xe6   : > { %s3868_s14 = scalar_lea.vmem %s4289_s4, %s2595_s29  ;;  %s2596_s8 = sshll.u32 %s4362_s18, 1 }
  0xe7   : > { %4290 = sst [smem:[#allocation51_spill]] %s3868_s14  ;;  %s1141_s28 = sadd.s32 %s2596_s8, %s4360_s20 }
  0xe8   : > { %s2659_s22 = sshll.u32 %s4362_s18, 4  ;;  %s2597_s12 = sshll.u32 %s1141_s28, 3 }
  0xe9   : > { %s3873_s9 = scalar_lea.vmem %s4291_s0, %s2659_s22  ;;  %s3878_s13 = scalar_lea.vmem %s4292_s30, %s2597_s12 }
  0xea   : > { %s2660_s7 = sshll.u32 %s4362_s18, 3  ;;  %s2603_s24 = sshll.u32 %s4362_s18, 2 }
  0xeb   : > { %s3883_s29 = scalar_lea.vmem %s4293_s1, %s2660_s7  ;;  %s4296_s18 = sld [smem:[#allocation59_spill]] }
  0xec   : > { %4294 = sst [smem:[#allocation52_spill]] %s3883_s29  ;;  %s1131_s1 = scalar_lea.vmem [#allocation18], %s3858_s23 }
  0xed   : > { %s1157_s20 = scalar_select %p1156_p6, %s4288_s3, 1 }
  0xee   : > { %s4297_s5 = sld [smem:[#allocation61_spill]]  ;;  %p2617_p9 = scmp.ne.s32.totalorder %s4288_s3, 0 }
  0xef   : > { %s2602_s4 = sshll.u32 %s1157_s20, 1  ;;  %s3886_s28 = sadd.s32 %s2596_s8, %s1157_s20 }
  0xf0   : > { %s1160_s16 = sadd.s32 %s2603_s24, %s2602_s4  ;;  %s2612_s7 = sshll.u32 %s1157_s20, 3 }
  0xf1   : > { %s3892_s12 = sshll.u32 %s1160_s16, 2  ;;  %s4298_s4 = sld [smem:[#allocation65_spill]] }
  0xf2   : > { %s1162_s15 = scalar_lea.vmem %s4296_s18, %s3892_s12  ;;  %s1194_s6 = sadd.s32 %s2659_s22, %s2612_s7 }
  0xf3   : > { %s2614_s30 = sshll.u32 %s1194_s6, 2  ;;  %s4299_s0 = sld [smem:[#allocation68_spill]] }
  0xf4   : > { %s1171_s27 = scalar_lea.vmem %s4297_s5, %s3892_s12  ;;  %s4300_s29 = sld [smem:[#allocation67_spill]] }
  0xf5   : > { %s4301_s18 = sld [smem:[#allocation69_spill]]  ;;  %s971_s5 = scalar_lea.vmem [#allocation17], %s3837_s2 }
  0xf6   : > { %s4302_s26 = sld [smem:[#allocation33_spill]] (!%p2617_p9) }
  0xf7   : > { %s1180_s25 = scalar_lea.vmem %s4298_s4, %s3892_s12  ;;  %1215 = sbr.rel (%p2617_p9) target bundleno = 471 (0x1d7), region = 136 }
  0xf9   : > { %s1203_s19 = scalar_lea.vmem %s4299_s0, %s3886_s28 }
  0xfa   : > { %s3913_s21 = scalar_lea.vmem %s4300_s29, %s2614_s30 }
  0xfb   : > { %s1210_s8 = scalar_lea.vmem %s4301_s18, %s3886_s28 }
  0xfc   : > { %p2618_p12 = scmp.ne.s32.totalorder %s4302_s26, 0 }
  0xfe   : > { %1219 = sbr.rel (%p2618_p12) target bundleno = 261 (0x105), region = 140 }
 0x103   : > { %vm1220_vm0 = vcmask 261120   ;;  %v3391_v0 = vmov 0.0  }
 0x104   : > { %1221 = vst.msk [vmem:[#allocation5] sm:$0xff] %vm1220_vm0, %v3391_v0 }
 0x105 PF: > { %v2978_v1 = vld [vmem:[%s3873_s9 + $0x8] sm:$0xff]   ;;  %s4303_s14 = sld [smem:[#allocation50_spill]]  ;;  %v3392_v2 = vmov 0.0   ;;  %v2979_v3 = vld [vmem:[%s3873_s9] sm:$0xff]   ;;  %vm3393_vm1 = vmmov 0   ;;  %vm1225_vm2 = vcmask 261120  }
 0x106   : > { %2693 = vmatprep.subr.bf16.mxu0 %v3392_v2  ;;  %2697 = vmatprep.mubr.msk.bf16.mxu0 %vm3393_vm1, %v3392_v2  ;;  %v1222_v4 = vld [vmem:[%s3878_s13] sm:$0xff]  ;;  %vm1294_vm3 = vcmask 130048  }
 0x107   : > { %2694 = vmatpush3.bf16.msra.mxu0 %v2978_v1 }
 0x108   : > { %2695 = vmatprep.subr.bf16.mxu0 %v3392_v2 }
 0x10b   : > { %v1223_v5 = vld [vmem:[#allocation5] sm:$0xff]  ;;  %2696 = vmatpush3.bf16.msra.mxu0 %v2979_v3  ;;  %s4304_s3 = scalar_lea.vmem [#allocation6], %s4303_s14 }
 0x10c   : > { %v1224_v6 = vadd.f32 %v1223_v5, %v1222_v4  ;;  %v2619_v8 = vld [vmem:[%s4304_s3] ss:$0 sm:$0xff] }
 0x10e   : > { %1226 = vst.msk [vmem:[#allocation4] sm:$0xff] %vm1225_vm2, %v1224_v6  ;;  %v1227_v7 = vpack.c.bf16 %v1224_v6, %v1224_v6 }
 0x110   : > { %2698 = vmatmul.mubr.msk.bf16.vlgmr.msra.gmra.mxu0 %vm1225_vm2, %v1227_v7 }
 0x1d0   : > { %v1288_v9 = vpop.f32.mrf.mxu0 }
 0x1d1   : > { %v1289_v10 = vadd.f32 %v2619_v8, %v1288_v9 }
 0x1d2   : > { %v2699_v11 = vpop.f32.mrf.mxu0 }
 0x1d3   : > { %1295 = vst.msk [vmem:[#allocation2] sm:$0xff] %vm1294_vm3, %v1289_v10 }
 0x1d4   : > { %v1291_v12 = vpop.f32.mrf.mxu0 }
 0x1d6   : > { %v2700_v13 = vpop.f32.mrf.mxu0 }
 0x1d7 PF: > { %v2980_v14 = vld [vmem:[%s1162_s15] sm:$0xff]   ;;  %v3394_v15 = vmov 0.0   ;;  %vm1313_vm4 = vcmask 130048   ;;  %vm3395_vm5 = vmmov 0   ;;  %s4306_s29 = scalar_lea.vmem [#allocation11], %s3837_s2  ;;  %s3396_s0 = smov 124  }
 0x1d8   : > { %2701 = vmatprep.subr.bf16.mxu0 %v3394_v15  ;;  %2719 = vmatprep.subr.bf16.mxu1 %v3394_v15  ;;  %v2623_v18 = vld [vmem:[%s4306_s29] ss:$0 sm:$0xff]  ;;  %s3397_s7 = smov 112   ;;  %s3398_s15 = smov 104   ;;  %vm1361_vm6 = vcmask 31744   ;;  %vm1409_vm7 = vcmask 64512  }
 0x1d9   : > { %2702 = vmatpush3.bf16.msra.mxu0 %v2980_v14  ;;  %2703 = vmatprep.mubr.msk.bf16.mxu0 %vm3395_vm5, %v3394_v15  ;;  %s3399_s24 = smov 108   ;;  %s3400_s4 = smov 100   ;;  %vm1427_vm8 = vcmask 1043456   ;;  %vm1587_vm9 = vcmask 64544   ;;  %vm1704_vm10 = vcmask 97344   ;;  %vm1821_vm11 = vcmask 130144  }
 0x1da   : > { %v3934_v16 = vld [vmem:[#allocation2] sm:$0xff]  ;;  %2707 = vmatprep.subr.bf16.mxu0 %v3394_v15  ;;  %2721 = vmatprep.mubr.msk.bf16.mxu1 %vm3395_vm5, %v3394_v15  ;;  %s3401_s6 = smov 120   ;;  %s3402_s30 = smov 116   ;;  %vm2022_vm12 = vcmask 523264  }
 0x1db   : > { %v1297_v17 = vpack.c.bf16 %v3934_v16, %v3934_v16  ;;  %s3403_s16 = smov 92   ;;  %s3404_s11 = smov 96  }
 0x1dc   : > { %s3405_s20 = smov 84   ;;  %s3406_s10 = smov 88  }
 0x1dd   : > { %2704 = vmatmul.mubr.msk.bf16.vlgmr.msra.gmra.mxu0 %vm1313_vm4, %v1297_v17  ;;  %s3407_s17 = smov 4   ;;  %s3408_s3 = smov 8  }
 0x1de   : > { %2709 = vmatprep.mubr.msk.bf16.mxu0 %vm3395_vm5, %v3394_v15  ;;  %s3409_s9 = smov 12  }
 0x29d   : > { %v1351_v19 = vpop.f32.mrf.mxu0 }
 0x29e   : > { %v1352_v20 = vadd.f32 %v2623_v18, %v1351_v19 }
 0x29f   : > { %v2705_v21 = vpop.f32.mrf.mxu0 }
 0x2a0   : > { %v3949_v22 = vpack.c.bf16 %v1352_v20, %v1352_v20 }
 0x2a1   : > { %v1354_v23 = vpop.f32.mrf.mxu0 }
 0x2a2   : > { %1472 = vrot.lane.b32.xlu1 %v3949_v22, %s3396_s0  ;;  %1359 = vrot.lane.b32.xlu0 %v3949_v22, %s3397_s7  ;;  %s4310_s0 = scalar_lea.vmem [#allocation14], %s3837_s2  ;;  %s4311_s7 = scalar_lea.vmem [#allocation15], %s3837_s2 }
 0x2a3   : > { %v2706_v24 = vpop.f32.mrf.mxu0 }
 0x2a6   : > { %1591 = vrot.lane.b32.xlu1 %v3949_v22, %s3398_s15  ;;  %1474 = vrot.lane.b32.xlu0 %v3949_v22, %s3399_s24  ;;  %s4312_s15 = sld [smem:[#allocation66_spill]] }
 0x2aa   : > { %1708 = vrot.lane.b32.xlu1 %v3949_v22, %s3400_s4  ;;  %1589 = vrot.lane.b32.xlu0 %v3949_v22, %s3401_s6 }
 0x2ac   : > { %s4313_s24 = scalar_lea.vmem %s4312_s15, %s3886_s28 }
 0x2ae   : > { %1706 = vrot.lane.b32.xlu0 %v3949_v22, %s3402_s30 }
 0x314   : > { %v1360_v25 = vpop.permute.xlu0 %1359  ;;  %v1473_v27 = vpop.permute.xlu1 %1472 }
 0x315   : > { %v1366_v26 = vsel %vm1361_vm6, %v1360_v25, 0 }
 0x316   : > { %2708 = vmatpush3.bf16.xpose.msra.mxu0 %v1366_v26 }
 0x317   : > { %2713 = vmatprep.subr.bf16.mxu0 %v3394_v15 }
 0x318   : > { %v1475_v28 = vpop.permute.xlu0 %1474  ;;  %v1592_v30 = vpop.permute.xlu1 %1591 }
 0x319   : > { %v1480_v29 = vsel %vm1361_vm6, %v1475_v28, 0  ;;  %v1597_v31 = vsel %vm1361_vm6, %v1592_v30, 0 }
 0x31a   : > { %2720 = vmatpush3.bf16.xpose.msra.mxu1 %v1480_v29 }
 0x31b   : > { %2731 = vmatprep.subr.bf16.mxu1 %v3394_v15 }
 0x31c   : > { %v1709_v32 = vpop.permute.xlu1 %1708  ;;  %v1590_v33 = vpop.permute.xlu0 %1589 }
 0x31d   : > { %2710 = vmatmul.mubr.msk.bf16.vlgmr.msra.gmra.mxu0 %vm1361_vm6, %v3949_v22  ;;  %v1714_v34 = vsel %vm1361_vm6, %v1709_v32, 0 }
 0x31e   : > { %2715 = vmatprep.mubr.msk.bf16.mxu0 %vm3395_vm5, %v3394_v15 }
 0x320   : > { %v1707_v35 = vpop.permute.xlu0 %1706 }
 0x321   : > { %2722 = vmatmul.mubr.msk.bf16.vlgmr.msra.gmra.mxu1 %vm1361_vm6, %v1473_v27 }
 0x322   : > { %2732 = vmatpush3.bf16.xpose.msra.mxu1 %v1597_v31  ;;  %2733 = vmatprep.mubr.msk.bf16.mxu1 %vm3395_vm5, %v3394_v15 }
 0x323   : > { %2743 = vmatprep.subr.bf16.mxu1 %v3394_v15 }
 0x329   : > { %2734 = vmatmul.mubr.msk.bf16.vlgmr.msra.gmra.mxu1 %vm1361_vm6, %v1590_v33 }
 0x32a   : > { %2744 = vmatpush3.bf16.xpose.msra.mxu1 %v1714_v34  ;;  %2745 = vmatprep.mubr.msk.bf16.mxu1 %vm3395_vm5, %v3394_v15 }
 0x32b   : > { %2755 = vmatprep.subr.bf16.mxu1 %v3394_v15 }
 0x331   : > { %2746 = vmatmul.mubr.msk.bf16.vlgmr.msra.gmra.mxu1 %vm1361_vm6, %v1707_v35 }
 0x332   : > { %2757 = vmatprep.mubr.msk.bf16.mxu1 %vm3395_vm5, %v3394_v15 }
 0x3dd   : > { %v1402_v36 = vpop.f32.mrf.mxu0 }
 0x3de   : > { %v1408_v37 = vmul.f32 0.5, %v1402_v36 }
 0x3df   : > { %v2711_v38 = vpop.f32.mrf.mxu0 }
 0x3e0   : > { %v1410_v39 = vsel %vm1409_vm7, %v1408_v37, -inf }
 0x3e1   : > { %v1516_v40 = vpop.f32.mrf.mxu1  ;;  %1411 = vmax.xlane.f32.xlu1 %v1410_v39  ;;  %v1405_v41 = vpop.f32.mrf.mxu0 }
 0x3e2   : > { %v1522_v42 = vmul.f32 0.5, %v1516_v40 }
 0x3e3   : > { %v2712_v43 = vpop.f32.mrf.mxu0  ;;  %v2723_v44 = vpop.f32.mrf.mxu1 }
 0x3e4   : > { %v1523_v45 = vsel %vm1409_vm7, %v1522_v42, -inf }
 0x3e5   : > { %1524 = vmax.xlane.f32.xlu0 %v1523_v45  ;;  %v1519_v46 = vpop.f32.mrf.mxu1 }
 0x3e7   : > { %v2724_v47 = vpop.f32.mrf.mxu1 }
 0x3e9   : > { %v1633_v48 = vpop.f32.mrf.mxu1 }
 0x3ea   : > { %v1639_v49 = vmul.f32 0.5, %v1633_v48 }
 0x3eb   : > { %v2735_v50 = vpop.f32.mrf.mxu1 }
 0x3ec   : > { %v1640_v51 = vsel %vm1409_vm7, %v1639_v49, -inf  ;;  %v2981_v50 = vld [vmem:[%s1171_s27] sm:$0xff]   ;;  %s4308_s27 = scalar_lea.vmem [#allocation12], %s3837_s2 }
 0x3ed   : > { %1641 = vmax.xlane.f32.xlu0 %v1640_v51  ;;  %v1636_v52 = vpop.f32.mrf.mxu1  ;;  %2756 = vmatpush3.bf16.msra.mxu1 %v2981_v50 }
 0x3ee   : > { %2767 = vmatprep.subr.bf16.mxu1 %v3394_v15 }
 0x3ef   : > { %v2736_v53 = vpop.f32.mrf.mxu1 }
 0x3f1   : > { %v1750_v54 = vpop.f32.mrf.mxu1 }
 0x3f2   : > { %v1756_v55 = vmul.f32 0.5, %v1750_v54 }
 0x3f3   : > { %v2747_v56 = vpop.f32.mrf.mxu1 }
 0x3f4   : > { %v1757_v57 = vsel %vm1409_vm7, %v1756_v55, -inf }
 0x3f5   : > { %v1753_v58 = vpop.f32.mrf.mxu1  ;;  %1758 = vmax.xlane.f32.xlu1 %v1757_v57 }
 0x3f7   : > { %v2748_v59 = vpop.f32.mrf.mxu1 }
 0x46a   : > { %v1412_v60 = vpop.xlane.xlu1 %1411 }
 0x46b   : > { %v1413_v61 = vsub.f32 %v1408_v37, %v1412_v60 }
 0x46d   : > { %v1414_v62 = vmul.f32 1.442695, %v1413_v61 }
 0x46e   : > { %v1525_v63 = vpop.xlane.xlu0 %1524 }
 0x46f   : > { %2987 = vpow2.f32 %v1414_v62  ;;  %v1526_v0 = vsub.f32 %v1522_v42, %v1525_v63 }
 0x471   : > { %v1527_v1 = vmul.f32 1.442695, %v1526_v0  ;;  %v2634_v0 = vld [vmem:[%s4308_s27] ss:$0 sm:$0xff] }
 0x473   : > { %2989 = vpow2.f32 %v1527_v1 }
 0x476   : > { %v1642_v2 = vpop.xlane.xlu0 %1641 }
 0x477   : > { %v1643_v3 = vsub.f32 %v1639_v49, %v1642_v2 }
 0x479   : > { %v1644_v4 = vmul.f32 1.442695, %v1643_v3 }
 0x47b   : > { %2991 = vpow2.f32 %v1644_v4 }
 0x47c   : > { %v2988_v5 = vpop.eup %2987 }
 0x47d   : > { %v1416_v6 = vsel %vm1409_vm7, %v2988_v5, 0.0 }
 0x47e   : > { %1417 = vadd.xlane.f32.xlu0 %v1416_v6  ;;  %v1759_v11 = vpop.xlane.xlu1 %1758 }
 0x47f   : > { %v1760_v12 = vsub.f32 %v1756_v55, %v1759_v11 }
 0x480   : > { %v2990_v7 = vpop.eup %2989 }
 0x481   : > { %v1529_v8 = vsel %vm1409_vm7, %v2990_v7, 0.0  ;;  %v1761_v13 = vmul.f32 1.442695, %v1760_v12 }
 0x482   : > { %1530 = vadd.xlane.f32.xlu1 %v1529_v8 }
 0x483   : > { %2993 = vpow2.f32 %v1761_v13 }
 0x488   : > { %v2992_v9 = vpop.eup %2991 }
 0x489   : > { %v1646_v10 = vsel %vm1409_vm7, %v2992_v9, 0.0 }
 0x48a   : > { %1647 = vadd.xlane.f32.xlu0 %v1646_v10 }
 0x490   : > { %v2994_v14 = vpop.eup %2993 }
 0x491   : > { %v1763_v17 = vsel %vm1409_vm7, %v2994_v14, 0.0 }
 0x493   : > { %1535 = vrot.lane.b32.xlu1 %v3949_v22, %s3403_s16 }
 0x4a0   : > { %1422 = vrot.lane.b32.xlu0 %v3949_v22, %s3404_s11  ;;  %s4316_s11 = sld [smem:[#allocation32_spill]] }
 0x4a4   : > { %1769 = vrot.lane.b32.xlu0 %v3949_v22, %s3405_s20 }
 0x4a6   : > { %p2650_p13 = scmp.ne.s32.totalorder %s4316_s11, 1 }
 0x4a7   : > { %s4317_s20 = sld [smem:[#allocation52_spill]] (!%p2650_p13) }
 0x4a8   : > { %s4320_s28 = sld [smem:[#allocation33_spill]] (!%p2650_p13) }
 0x4ae   : > { %p2654_p1 = scmp.ne.s32.totalorder (!%p2650_p13), %s4320_s28, 1 }
 0x4b7   : > { %1764 = vadd.xlane.f32.xlu1 %v1763_v17 }
 0x4c8   : > { %1652 = vrot.lane.b32.xlu1 %v3949_v22, %s3406_s10  ;;  %s4318_s10 = sld [smem:[#allocation50_spill]] (!%p2650_p13) }
 0x4ce   : > { %s4319_s2 = scalar_lea.vmem (!%p2650_p13), [#allocation9], %s4318_s10 }
 0x507   : > { %v1418_v18 = vpop.xlane.xlu0 %1417 }
 0x508   : > { %2995 = vrcp.f32 %v1418_v18 }
 0x50b   : > { %v1531_v19 = vpop.xlane.xlu1 %1530 }
 0x50c   : > { %2997 = vrcp.f32 %v1531_v19  ;;  %v2637_v19 = vld [vmem:[%s4310_s0] ss:$0 sm:$0xff] }
 0x50f   : > { %v1536_v26 = vpop.permute.xlu1 %1535 }
 0x510   : > { %v1541_v29 = vsel %vm1427_vm8, %v1536_v26, 0  ;;  %v2983_v26 = vld [vmem:[%s3913_s21 + $0x18] sm:$0xff]  }
 0x513   : > { %v1648_v20 = vpop.xlane.xlu0 %1647 }
 0x514   : > { %2999 = vrcp.f32 %v1648_v20 }
 0x515   : > { %v2996_v21 = vpop.eup %2995 }
 0x516   : > { %v1420_v23 = vmul.f32 %v2996_v21, %v2988_v5  ;;  %v2638_v21 = vld [vmem:[%s4311_s7] ss:$0 sm:$0xff] }
 0x517   : > { %v1423_v24 = vpop.permute.xlu0 %1422 }
 0x518   : > { %v1429_v25 = vsel %vm1427_vm8, %v1423_v24, 0  ;;  %v1421_v27 = vpack.c.bf16 %v1420_v23, %v1420_v23 }
 0x519   : > { %2714 = vmatpush3.bf16.msra.mxu0 %v1429_v25  ;;  %v2998_v28 = vpop.eup %2997 }
 0x51a   : > { %2725 = vmatprep.subr.bf16.mxu0 %v3394_v15  ;;  %v1533_v22 = vmul.f32 %v2998_v28, %v2990_v7  ;;  %v2985_v28 = vld [vmem:[%s3913_s21 + $0x8] sm:$0xff]  }
 0x51b   : > { %v1770_v36 = vpop.permute.xlu0 %1769 }
 0x51c   : > { %2716 = vmatmul.mubr.msk.bf16.vlgmr.msra.gmra.mxu0 %vm1409_vm7, %v1421_v27  ;;  %v1534_v30 = vpack.c.bf16 %v1533_v22, %v1533_v22  ;;  %v1775_v38 = vsel %vm1427_vm8, %v1770_v36, 0  ;;  %v2984_v27 = vld [vmem:[%s3913_s21 + $0x10] sm:$0xff]   ;;  %v2639_v22 = vld [vmem:[%s4313_s24] ss:$0 sm:$0xff] }
 0x51d   : > { %2726 = vmatpush3.bf16.msra.mxu0 %v1541_v29  ;;  %2727 = vmatprep.mubr.msk.bf16.mxu0 %vm3395_vm5, %v3394_v15  ;;  %v2986_v29 = vld [vmem:[%s3913_s21] sm:$0xff]  }
 0x51e   : > { %2737 = vmatprep.subr.bf16.mxu0 %v3394_v15 }
 0x521   : > { %v3000_v31 = vpop.eup %2999 }
 0x522   : > { %v1650_v33 = vmul.f32 %v3000_v31, %v2992_v9 }
 0x524   : > { %2728 = vmatmul.mubr.msk.bf16.vlgmr.msra.gmra.mxu0 %vm1409_vm7, %v1534_v30  ;;  %v1651_v37 = vpack.c.bf16 %v1650_v33, %v1650_v33 }
 0x525   : > { %2739 = vmatprep.mubr.msk.bf16.mxu0 %vm3395_vm5, %v3394_v15 }
 0x540   : > { %v1765_v32 = vpop.xlane.xlu1 %1764 }
 0x541   : > { %3001 = vrcp.f32 %v1765_v32 }
 0x544   : > { %v1653_v34 = vpop.permute.xlu1 %1652 }
 0x545   : > { %v1658_v35 = vsel %vm1427_vm8, %v1653_v34, 0 }
 0x546   : > { %2738 = vmatpush3.bf16.msra.mxu0 %v1658_v35 }
 0x547   : > { %2749 = vmatprep.subr.bf16.mxu0 %v3394_v15 }
 0x549   : > { %2740 = vmatmul.mubr.msk.bf16.vlgmr.msra.gmra.mxu0 %vm1409_vm7, %v1651_v37 }
 0x54a   : > { %2750 = vmatpush3.bf16.msra.mxu0 %v1775_v38  ;;  %2751 = vmatprep.mubr.msk.bf16.mxu0 %vm3395_vm5, %v3394_v15 }
 0x54b   : > { %2761 = vmatprep.subr.bf16.mxu0 %v3394_v15 }
 0x54e   : > { %v3002_v39 = vpop.eup %3001 }
 0x54f   : > { %v1767_v40 = vmul.f32 %v3002_v39, %v2994_v14 }
 0x551   : > { %v1768_v41 = vpack.c.bf16 %v1767_v40, %v1767_v40 }
 0x553   : > { %2752 = vmatmul.mubr.msk.bf16.vlgmr.msra.gmra.mxu0 %vm1409_vm7, %v1768_v41 }
 0x554   : > { %2763 = vmatprep.mubr.msk.bf16.mxu0 %vm3395_vm5, %v3394_v15 }
 0x5dc   : > { %v1465_v42 = vpop.f32.mrf.mxu0 }
 0x5dd   : > { %1471 = vst.msk [vmem:[#allocation3] sm:$0xff] %vm1361_vm6, %v1465_v42 }
 0x5de   : > { %v2717_v43 = vpop.f32.mrf.mxu0 }
 0x5e0   : > { %v1468_v44 = vpop.f32.mrf.mxu0 }
 0x5e1   : > { %v2642_v44 = vld [vmem:[%s1203_s19] ss:$0 sm:$0xff] }
 0x5e2   : > { %v2718_v45 = vpop.f32.mrf.mxu0 }
 0x5e4   : > { %v1577_v46 = vpop.f32.mrf.mxu0 }
 0x5e5   : > { %1584 = vrot.lane.b32.xlu1 %v1577_v46, %s3407_s17 }
 0x5e6   : > { %v2729_v47 = vpop.f32.mrf.mxu0 }
 0x5e8   : > { %v1580_v48 = vpop.f32.mrf.mxu0 }
 0x5ea   : > { %v2730_v49 = vpop.f32.mrf.mxu0 }
 0x609   : > { %v1694_v51 = vpop.f32.mrf.mxu0 }
 0x60a   : > { %1701 = vrot.lane.b32.xlu0 %v1694_v51, %s3408_s3 }
 0x60b   : > { %v2741_v52 = vpop.f32.mrf.mxu0 }
 0x60d   : > { %v1697_v53 = vpop.f32.mrf.mxu0 }
 0x60f   : > { %v2742_v54 = vpop.f32.mrf.mxu0 }
 0x613   : > { %v1811_v55 = vpop.f32.mrf.mxu0 }
 0x614   : > { %1818 = vrot.lane.b32.xlu1 %v1811_v55, %s3409_s9 }
 0x615   : > { %v2753_v56 = vpop.f32.mrf.mxu0 }
 0x617   : > { %v1814_v57 = vpop.f32.mrf.mxu0 }
 0x619   : > { %v2754_v58 = vpop.f32.mrf.mxu0 }
 0x657   : > { %v1585_v59 = vpop.permute.xlu1 %1584 }
 0x658   : > { %1588 = vst.msk [vmem:[#allocation3] sm:$0xff] %vm1587_vm9, %v1585_v59 }
 0x67c   : > { %v1702_v60 = vpop.permute.xlu0 %1701 }
 0x67d   : > { %1705 = vst.msk [vmem:[#allocation3] sm:$0xff] %vm1704_vm10, %v1702_v60 }
 0x686   : > { %v1819_v61 = vpop.permute.xlu1 %1818 }
 0x687   : > { %1822 = vst.msk [vmem:[#allocation3] sm:$0xff] %vm1821_vm11, %v1819_v61  ;;  %v2648_v61 = vld [vmem:[%s1210_s8] ss:$0 sm:$0xff] }
 0x68e   : > { %v1823_v62 = vld [vmem:[#allocation3] sm:$0xff] }
 0x68f   : > { %v1824_v63 = vpack.c.bf16 %v1823_v62, %v1823_v62 }
 0x691   : > { %2758 = vmatmul.mubr.msk.bf16.vlgmr.msra.gmra.mxu1 %vm1313_vm4, %v1824_v63  ;;  %v2649_v63 = vld [vmem:[%s971_s5] ss:$0 sm:$0xff] }
 0x692   : > { %2775 = vmatprep.mubr.msk.bf16.mxu1 %vm3395_vm5, %v3394_v15  ;;  %2768 = vmatpush3.bf16.msra.mxu1 %v2983_v26 }
 0x693   : > { %2769 = vmatprep.subr.bf16.mxu1 %v3394_v15 }
 0x696   : > { %2770 = vmatpush3.bf16.msra.mxu1 %v2984_v27 }
 0x697   : > { %2771 = vmatprep.subr.bf16.mxu1 %v3394_v15 }
 0x69a   : > { %2772 = vmatpush3.bf16.msra.mxu1 %v2985_v28 }
 0x69b   : > { %2773 = vmatprep.subr.bf16.mxu1 %v3394_v15 }
 0x69e   : > { %2774 = vmatpush3.bf16.msra.mxu1 %v2986_v29 }
 0x751   : > { %v1877_v1 = vpop.f32.mrf.mxu1 }
 0x752   : > { %v1878_v2 = vadd.f32 %v2634_v0, %v1877_v1 }
 0x753   : > { %v2759_v3 = vpop.f32.mrf.mxu1 }
 0x754   : > { %v1883_v4 = vadd.f32 %v1878_v2, %v3934_v16  ;;  %v2982_v16 = vld [vmem:[%s1180_s25] sm:$0xff]  }
 0x755   : > { %v1880_v5 = vpop.f32.mrf.mxu1  ;;  %2762 = vmatpush3.bf16.msra.mxu0 %v2982_v16 }
 0x756   : > { %v1886_v6 = vsel %vm1313_vm4, %v1883_v4, 0.0 }
 0x757   : > { %1887 = vadd.xlane.f32.xlu0 %v1886_v6  ;;  %v2760_v7 = vpop.f32.mrf.mxu1 }
 0x7e0   : > { %v1888_v8 = vpop.xlane.xlu0 %1887 }
 0x7e1   : > { %v1890_v9 = vmul.f32 0.0625, %v1888_v8 }
 0x7e3   : > { %v1891_v10 = vsub.f32 %v1883_v4, %v1890_v9 }
 0x7e5   : > { %v1892_v11 = vmul.f32 %v1891_v10, %v1891_v10 }
 0x7e7   : > { %v1893_v12 = vsel %vm1313_vm4, %v1892_v11, 0.0 }
 0x7e8   : > { %1894 = vadd.xlane.f32.xlu1 %v1893_v12 }
 0x871   : > { %v1895_v13 = vpop.xlane.xlu1 %1894 }
 0x872   : > { %v1896_v14 = vmul.f32 0.0625, %v1895_v13 }
 0x874   : > { %v1897_v17 = vadd.f32 1e-05, %v1896_v14 }
 0x876   : > { %3003 = vrsqrt.f32 %v1897_v17 }
 0x883   : > { %v3004_v18 = vpop.eup %3003 }
 0x884   : > { %v1899_v20 = vmul.f32 %v3004_v18, %v1891_v10 }
 0x886   : > { %v1906_v23 = vmul.f32 %v2637_v19, %v1899_v20 }
 0x888   : > { %v1913_v24 = vadd.f32 %v2638_v21, %v1906_v23 }
 0x88a   : > { %v1914_v25 = vpack.c.bf16 %v1913_v24, %v1913_v24 }
 0x88c   : > { %2764 = vmatmul.mubr.msk.bf16.vlgmr.msra.gmra.mxu0 %vm1313_vm4, %v1914_v25 }
 0x94c   : > { %v1967_v30 = vpop.f32.mrf.mxu0 }
 0x94d   : > { %v1968_v31 = vadd.f32 %v2639_v22, %v1967_v30 }
 0x94e   : > { %v2765_v32 = vpop.f32.mrf.mxu0 }
 0x94f   : > { %v1974_v33 = vmul.f32 0.044715, %v1968_v31  ;;  %v1973_v15 = vmul.f32 0.5, %v1968_v31 }
 0x950   : > { %v1970_v34 = vpop.f32.mrf.mxu0 }
 0x951   : > { %v1975_v35 = vmul.f32 %v1974_v33, %v1968_v31 }
 0x952   : > { %v2766_v36 = vpop.f32.mrf.mxu0 }
 0x953   : > { %v1976_v37 = vmul.f32 %v1975_v35, %v1968_v31 }
 0x955   : > { %v1977_v38 = vadd.f32 %v1976_v37, %v1968_v31 }
 0x957   : > { %v1978_v39 = vmul.f32 0.7978846, %v1977_v38 }
 0x959   : > { %3005 = vtanh.f32 %v1978_v39 }
 0x966   : > { %v3006_v40 = vpop.eup %3005 }
 0x967   : > { %v1980_v41 = vadd.f32 1.0, %v3006_v40 }
 0x969   : > { %v1981_v42 = vmul.f32 %v1980_v41, %v1973_v15 }
 0x96b   : > { %v1982_v43 = vpack.c.bf16 %v1981_v42, %v1981_v42 }
 0x96d   : > { %2776 = vmatmul.mubr.msk.bf16.vlgmr.msra.gmra.mxu1 %vm2022_vm12, %v1982_v43 }
 0xa2d   : > { %v2060_v45 = vpop.f32.mrf.mxu1 }
 0xa2e   : > { %v2061_v46 = vadd.f32 %v2642_v44, %v2060_v45 }
 0xa2f   : > { %v2777_v47 = vpop.f32.mrf.mxu1 }
 0xa30   : > { %v2066_v48 = vadd.f32 %v2061_v46, %v1913_v24 }
 0xa31   : > { %v2063_v49 = vpop.f32.mrf.mxu1 }
 0xa32   : > { %v2069_v50 = vsel %vm1313_vm4, %v2066_v48, 0.0 }
 0xa33   : > { %2070 = vadd.xlane.f32.xlu0 %v2069_v50  ;;  %v2778_v51 = vpop.f32.mrf.mxu1 }
 0xabc   : > { %v2071_v52 = vpop.xlane.xlu0 %2070 }
 0xabd   : > { %v2072_v53 = vmul.f32 0.0625, %v2071_v52 }
 0xabf   : > { %v2073_v54 = vsub.f32 %v2066_v48, %v2072_v53 }
 0xac1   : > { %v2074_v55 = vmul.f32 %v2073_v54, %v2073_v54 }
 0xac3   : > { %v2075_v56 = vsel %vm1313_vm4, %v2074_v55, 0.0 }
 0xac4   : > { %2076 = vadd.xlane.f32.xlu0 %v2075_v56 }
 0xb4d   : > { %v2077_v57 = vpop.xlane.xlu0 %2076 }
 0xb4e   : > { %v2078_v58 = vmul.f32 0.0625, %v2077_v57 }
 0xb50   : > { %v2079_v59 = vadd.f32 1e-05, %v2078_v58 }
 0xb52   : > { %3007 = vrsqrt.f32 %v2079_v59 }
 0xb5f   : > { %v3008_v60 = vpop.eup %3007 }
 0xb60   : > { %v2081_v62 = vmul.f32 %v3008_v60, %v2073_v54 }
 0xb62   : > { %v2088_v0 = vmul.f32 %v2648_v61, %v2081_v62  ;;  %2100 = sbr.rel (%p2650_p13) target bundleno = 3138 (0xc42), region = 144 }
 0xb64   : > { %v2095_v1 = vadd.f32 %v2649_v63, %v2088_v0 }
 0xb66   : > { %2096 = vst.msk [vmem:[#allocation2] sm:$0xff] %vm1313_vm4, %v2095_v1 }
 0xb67   : > { %v3009_v2 = vld [vmem:[%s4317_s20] sm:$0xff]   ;;  %v3410_v3 = vmov 0.0   ;;  %vm3411_vm13 = vmmov 0   ;;  %v2161_v8 = vld [vmem:[#allocation4] sm:$0xff]  ;;  %vm2163_vm14 = vcmask 261120   ;;  %s4321_s8 = sld [smem:[#allocation51_spill]] (!%p2654_p1) }
 0xb68   : > { %2779 = vmatprep.subr.bf16.mxu0 %v3410_v3  ;;  %2781 = vmatprep.mubr.msk.bf16.mxu0 %vm3411_vm13, %v3410_v3  ;;  %v2651_v6 = vld [vmem:[%s4319_s2] ss:$0 sm:$0xff] }
 0xb69   : > { %2780 = vmatpush3.bf16.msra.mxu0 %v3009_v2 }
 0xb6d   : > { %v2101_v4 = vld [vmem:[#allocation2] sm:$0xff] }
 0xb6e   : > { %v2102_v5 = vpack.c.bf16 %v2101_v4, %v2101_v4 }
 0xb70   : > { %2782 = vmatmul.mubr.msk.bf16.vlgmr.msra.gmra.mxu0 %vm1313_vm4, %v2102_v5 }
 0xc30   : > { %v2155_v7 = vpop.f32.mrf.mxu0 }
 0xc31   : > { %v2156_v9 = vadd.f32 %v2651_v6, %v2155_v7 }
 0xc32   : > { %v2783_v10 = vpop.f32.mrf.mxu0  ;;  %2168 = sbr.rel (%p2654_p1) target bundleno = 3138 (0xc42), region = 148 }
 0xc33   : > { %v2162_v11 = vadd.f32 %v2161_v8, %v2156_v9 }
 0xc34   : > { %v2158_v12 = vpop.f32.mrf.mxu0 }
 0xc35   : > { %2164 = vst.msk [vmem:[#allocation5] sm:$0xff] %vm2163_vm14, %v2162_v11 }
 0xc36   : > { %v2784_v16 = vpop.f32.mrf.mxu0 }
 0xc37   : > { %v2169_v13 = vld [vmem:[%s4321_s8] sm:$0xff] }
 0xc38   : > { %v2171_v17 = vmul.f32 0.5, %v2169_v13 }
 0xc3c   : > { %v2170_v14 = vld [vmem:[#allocation5] sm:$0xff] }
 0xc3d   : > { %v2172_v18 = vmul.f32 0.5, %v2170_v14 }
 0xc3f   : > { %v2173_v19 = vadd.f32 %v2172_v18, %v2171_v17 }
 0xc41   : > { %2174 = vst.msk [vmem:[%s1131_s1] sm:$0xff] %vm2163_vm14, %v2173_v19 }
 0xc42 PF: > { %s4322_s5 = sld [smem:[#allocation34_spill]]  ;;  %s2189_s13 = sshll.u32 %s1131_s1, 4  ;;  %s2190_s13 = int_to_ptr.vmem [resolvable:$true] %s2189_s13 }
 0xc43   : > { %s4323_s17 = sld [smem:[#allocation26_spill]]  ;;  %s3206_s0 = scalar_lea.vmem %s2190_s13, 128 }
 0xc44   : > { %s4325_s9 = sld [smem:[#allocation71_spill]]  ;;  %p3207_p8 = scmp.ne.s32.totalorder %s2190_s13, %s3206_s0 }
 0xc45   : > { %s3412_s7 = smov [#allocation18]  }
 0xc46   : > { %p3208_p2 = pnand %p3207_p8, %p3635_p0  ;;  %s3210_s25 = sshll.u32 %s3412_s7, 4  ;;  %s3211_s25 = int_to_ptr.vmem [resolvable:$false] %s3210_s25 }
 0xc47   : > { %s3212_s12 = scalar_lea.vmem %s3211_s25, 256  ;;  %p3213_p10 = scmp.lt.s32.totalorder %s2190_s13, %s3211_s25 }
 0xc48   : > { %s2656_s26 = sshll.u32 %s4322_s5, 7  ;;  %p3209_p4 = pneg %p3208_p2 }
 0xc49   : > { %s4326_s22 = sand.u32 1, %s4323_s17   ;;  %p3214_p11 = scmp.lt.s32.totalorder %s3212_s12, %s3206_s0 }
 0xc4a   : > { %s2187_s27 = scalar_lea.hbm %s4325_s9, %s2656_s26  ;;  %s2176_s29 = scalar_lea.sflag [#allocation8], %s4326_s22 }
 0xc4b   : > { %p3215_p5 = por %p3214_p11, %p3213_p10 }
 0xc4d   : > { %p3216_p3 = pnand %p3215_p5, %p3209_p4 }
 0xc4f   : > { %3219 = shalt.err (!%p3216_p3)
}
 0xc50   : > { %s3220_s15 = scalar_lea.hbm %s2187_s27, 128  ;;  %s3224_s24 = scalar_lea.hbm %s4325_s9, 256 }
 0xc51   : > { %p3221_p7 = scmp.ne.s32.totalorder %s2187_s27, %s3220_s15  ;;  %p3225_p12 = scmp.lt.s32.totalorder %s2187_s27, %s4325_s9 }
 0xc52   : > { %p3226_p13 = scmp.lt.s32.totalorder %s3224_s24, %s3220_s15 }
 0xc53   : > { %p3222_p6 = pnand %p3221_p7, %p3635_p0 }
 0xc54   : > { %p3227_p1 = por %p3226_p13, %p3225_p12 }
 0xc55   : > { %p3223_p9 = pneg %p3222_p6 }
 0xc57   : > { %p3228_p8 = pnand %p3227_p1, %p3223_p9 }
 0xc59   : > { %3231 = shalt.err (!%p3228_p8)
}
 0xc5a   : > { %2799 = dma.vmem_to_hbm [thread:$0]  (%p3635_p0), %s2190_s13, 128, %s2187_s27, %s2176_s29  }
 0xc5b PF: > { %s4327_s6 = sld [smem:[#allocation38_spill]] }
 0xc5c   : > { %s4328_s19 = sld [smem:[#allocation25_spill]] }
 0xc5d   : > { %s4329_s30 = sld [smem:[#allocation43_spill]] }
 0xc61   : > { %p2828_p2 = scmp.ge.s32.totalorder %s4327_s6, 2 }
 0xc62   : > { %s2201_s16 = sand.u32 1, %s4328_s19  }
 0xc63   : > { %p4330_p4 = scmp.ne.s32.totalorder %s4329_s30, 0  ;;  %s2202_s11 = scalar_lea.sflag [#allocation8], %s2201_s16 }
 0xc65   : > { %p2824_p10 = pnand %p2828_p2, %p4330_p4 }
 0xc67   : > { %p2825_p11 = pneg %p2824_p10 }
 0xc69   : > { %3317 = dma.done.wait (%p2825_p11), %s2202_s11, 128  }
 0xc6a   : > { %3319 = vsyncadd (%p2825_p11), %s2202_s11, 4294967168  ;;  %s46_s23 = sadd.s32 1, %s4327_s6   ;;  %s4332_s18 = sld [smem:[#allocation26_spill]] }
 0xc6b   : > { %p4097_p5 = scmp.ge.s32.totalorder %s46_s23, 10   ;;  %s4333_s2 = sld [smem:[#allocation27_spill]] }
 0xc6c   : > { %s4334_s19 = sld [smem:[#allocation49_spill]] }
 0xc6d   : > { %s4335_s10 = sld [smem:[#allocation28_spill]] }
 0xc6e   : > { %s4336_s25 = sld [smem:[#allocation29_spill]] }
 0xc6f   : > { %s4337_s26 = sld [smem:[#allocation48_spill]] }
 0xc70   : > { %s4338_s27 = sld [smem:[#allocation30_spill]] }
 0xc71   : > { %s4339_s3 = sld [smem:[#allocation31_spill]] }
 0xc72   : > { %s4340_s28 = sld [smem:[#allocation47_spill]] }
 0xc73   : > { %s4341_s29 = sld [smem:[#allocation35_spill]]  ;;  %s4348_s20 = smov %s4335_s10 }
 0xc74   : > { %s4342_s0 = sld [smem:[#allocation36_spill]]  ;;  %45 = sbr.rel (!%p4097_p5) target bundleno = 37 (0x25), region = 270 }
 0xc75   : > { %s4343_s4 = sld [smem:[#allocation37_spill]] }
 0xc76   : > { %s4344_s30 = sld [smem:[#allocation44_spill]] }
 0xc77   : > { %s4345_s5 = sld [smem:[#allocation45_spill]] }
 0xc78   : > { %s4346_s22 = sld [smem:[#allocation46_spill]] }
 0xc79   :  { %2207 = vsyncpa [#allocation7], 1 }
 0xc7a   :  { %2209 = vsyncpa [#allocation7 + $0x1], 1 }
 0xc7b   :  { %2210 = vsyncpa [#allocation10], 1 }
 0xc7c   :  { %2212 = vsyncpa [#allocation10 + $0x1], 1 }
 0xc7d   :  { %2213 = vsyncpa [#allocation13], 1 }
 0xc7e   :  { %2215 = vsyncpa [#allocation13 + $0x1], 1 }
 0xc7f   :  { %2216 = vsyncpa [#allocation16], 1 }
 0xc80   :  { %2218 = vsyncpa [#allocation16 + $0x1], 1 }
 0xc81   :  { %2219 = vsyncpa [#allocation8], 1 }
 0xc82   :  { %2221 = vsyncpa [#allocation8 + $0x1], 1 }

</bundles_post_ra>
